<compile_context>
chip_gen: v7x
topology: tpu7x:2x2x1
jax: 0.10.0
libtpu: 0.0.40
codegen_flags: <defaults>
</compile_context>

<pallas_src>
import jax
import jax.numpy as jnp
import numpy as np
from jax.experimental import pallas as pl
from jax.experimental.pallas import tpu as pltpu

HIDDEN = 256
GATES = 3 * HIDDEN          # i, g, o (forget gate dropped: c_prev == 0)
LN_EPS = 1e-5


def _round_up(n, m):
    return ((n + m - 1) // m) * m


# --------------------------------- kernel -----------------------------------

def lstm_salary_kernel(x_ref,
                       wih0_ref, wih1_ref, wih2_ref,
                       wfc1_ref, wfc2_ref, vec_ref,
                       out_ref):
    """One batch tile: 3 fused LSTM cells + LayerNorm + fc1 + ReLU + fc2."""
    n_mid = wfc1_ref.shape[1]                    # 2 * output_size
    n_out = wfc2_ref.shape[1]                    # output_size
    off_fc1 = 3 * GATES                          # 128-aligned (GATES = 6*128)
    off_fc2 = off_fc1 + _round_up(n_mid, 128)

    def lstm_cell(inp, w, b):
        # gates = inp @ W_ih[i,g,o]^T + (b_ih + b_hh)[i,g,o]; recurrent term = 0.
        gates = jnp.dot(inp.astype(jnp.bfloat16), w,
                        preferred_element_type=jnp.float32) + b
        i = jax.nn.sigmoid(gates[:, 0 * HIDDEN:1 * HIDDEN])
        g = jnp.tanh(gates[:, 1 * HIDDEN:2 * HIDDEN])
        o = jax.nn.sigmoid(gates[:, 2 * HIDDEN:3 * HIDDEN])
        return o * jnp.tanh(i * g)               # c = i * g since c_prev == 0

    b0 = vec_ref[:, 0 * GATES:1 * GATES]
    b1 = vec_ref[:, 1 * GATES:2 * GATES]
    b2 = vec_ref[:, 2 * GATES:3 * GATES]

    h = lstm_cell(x_ref[...], wih0_ref[...], b0)
    h = lstm_cell(h, wih1_ref[...], b1)
    h = lstm_cell(h, wih2_ref[...], b2)

    # LayerNorm over the 256-feature axis; gamma/beta are folded into fc1.
    mean = jnp.mean(h, axis=-1, keepdims=True)
    cen = h - mean
    var = jnp.mean(cen * cen, axis=-1, keepdims=True)
    hn = cen * jax.lax.rsqrt(var + LN_EPS)

    bfc1 = vec_ref[:, off_fc1:off_fc1 + n_mid]
    bfc2 = vec_ref[:, off_fc2:off_fc2 + n_out]

    y = jnp.dot(hn.astype(jnp.bfloat16), wfc1_ref[...],
                preferred_element_type=jnp.float32) + bfc1
    y = jnp.maximum(y, 0.0)
    out = jnp.dot(y.astype(jnp.bfloat16), wfc2_ref[...],
                  preferred_element_type=jnp.float32) + bfc2
    out_ref[...] = out.astype(out_ref.dtype)


def lstm_salary_predict(x, kp, *, batch_tile=512):
    """x: (B, input_size) f32. kp: dict of kernel-layout arrays (see below)."""
    batch, in_dim = x.shape
    n_out = kp["wfc2"].shape[1]

    # Batch tiling: one big tile for small batches, 512-row tiles (sharded
    # across TensorCores via "parallel") for large ones.
    tb = min(batch_tile, _round_up(batch, 8))
    b_pad = _round_up(batch, tb)
    if b_pad != batch:
        x = jnp.pad(x, ((0, b_pad - batch), (0, 0)))
    n_tiles = b_pad // tb

    const2 = lambda i: (0, 0)                    # weights: resident across grid
    out = pl.pallas_call(
        lstm_salary_kernel,
        out_shape=jax.ShapeDtypeStruct((b_pad, n_out), jnp.float32),
        grid=(n_tiles,),
        in_specs=[pl.BlockSpec((tb, in_dim), lambda i: (i, 0)),   # x
                  pl.BlockSpec(kp["wih0"].shape, const2),          # (in, 3H)
                  pl.BlockSpec(kp["wih1"].shape, const2),          # (H, 3H)
                  pl.BlockSpec(kp["wih2"].shape, const2),          # (H, 3H)
                  pl.BlockSpec(kp["wfc1"].shape, const2),          # (H, 2*out)
                  pl.BlockSpec(kp["wfc2"].shape, const2),          # (2*out, out)
                  pl.BlockSpec(kp["vec"].shape, const2)],          # packed biases
        out_specs=pl.BlockSpec((tb, n_out), lambda i: (i, 0)),
        compiler_params=pltpu.CompilerParams(
            dimension_semantics=("parallel",)),
    )(x, kp["wih0"], kp["wih1"], kp["wih2"], kp["wfc1"], kp["wfc2"], kp["vec"])

    if b_pad != batch:
        out = out[:batch]
    return out
    # Note: kernel output stays 2-D (B, out); PyTorch's .squeeze() only
    # changes rank for the degenerate batch==1 case.


# ----------------------------- parameter setup ------------------------------

def init_params(key, input_size, output_size):
    """Deterministic init mimicking PyTorch layouts (W_ih: (4H, in), etc.)."""
    keys = jax.random.split(key, 16)
    ki = iter(keys)
    bound = 1.0 / np.sqrt(HIDDEN)

    def u(k, shape, b):
        return jax.random.uniform(k, shape, jnp.float32, minval=-b, maxval=b)

    layers = []
    in_dim = input_size
    for _ in range(3):
        w_ih = u(next(ki), (4 * HIDDEN, in_dim), bound)
        w_hh = u(next(ki), (4 * HIDDEN, HIDDEN), bound)
        b_ih = u(next(ki), (4 * HIDDEN,), bound)
        b_hh = u(next(ki), (4 * HIDDEN,), bound)
        layers.append((w_ih, w_hh, b_ih, b_hh))
        in_dim = HIDDEN

    ln_g = jnp.ones((HIDDEN,), jnp.float32)
    ln_b = jnp.zeros((HIDDEN,), jnp.float32)

    b1 = 1.0 / np.sqrt(HIDDEN)
    w_fc1 = u(next(ki), (2 * output_size, HIDDEN), b1)
    b_fc1 = u(next(ki), (2 * output_size,), b1)
    b2 = 1.0 / np.sqrt(2 * output_size)
    w_fc2 = u(next(ki), (output_size, 2 * output_size), b2)
    b_fc2 = u(next(ki), (output_size,), b2)

    return dict(layers=layers, ln_g=ln_g, ln_b=ln_b,
                w_fc1=w_fc1, b_fc1=b_fc1, w_fc2=w_fc2, b_fc2=b_fc2)


def to_kernel_params(p):
    """Host-side re-layout: drop f-gate columns, fold b_ih+b_hh, fold LN into
    fc1, cast matmul weights to bf16, pack all small vectors into one array."""

    def keep_igo_cols(wt):        # wt: (in, 4H) -> (in, 3H): drop forget block
        return jnp.concatenate([wt[:, 0:HIDDEN], wt[:, 2 * HIDDEN:4 * HIDDEN]],
                               axis=1)

    def keep_igo_vec(v):          # (4H,) -> (3H,)
        return jnp.concatenate([v[0:HIDDEN], v[2 * HIDDEN:4 * HIDDEN]])

    wihs, biases = [], []
    for (w_ih, _w_hh, b_ih, b_hh) in p["layers"]:
        wihs.append(keep_igo_cols(w_ih.T).astype(jnp.bfloat16))   # (in, 3H)
        biases.append(keep_igo_vec(b_ih + b_hh))                  # (3H,)

    # Fold LayerNorm affine into fc1: y = z @ (g[:,None]*W1^T) + (beta@W1^T + b1)
    w1t = p["w_fc1"].T                                            # (256, 2*out)
    wfc1 = (p["ln_g"][:, None] * w1t).astype(jnp.bfloat16)
    bfc1 = p["b_fc1"] + p["ln_b"] @ w1t
    wfc2 = p["w_fc2"].T.astype(jnp.bfloat16)                      # (2*out, out)
    bfc2 = p["b_fc2"]

    def pad128(v):
        return jnp.pad(v, (0, _round_up(v.shape[0], 128) - v.shape[0]))

    vec = jnp.concatenate([biases[0], biases[1], biases[2],
                           pad128(bfc1), pad128(bfc2)]
                          ).reshape(1, -1).astype(jnp.float32)

    return dict(wih0=wihs[0], wih1=wihs[1], wih2=wihs[2],
                wfc1=wfc1, wfc2=wfc2, vec=vec)


# --------------------------- pure-JAX reference ------------------------------

def reference_forward(x, p):
    """Faithful f32 replication of the PyTorch forward (seq_len == 1)."""
    batch = x.shape[0]
    h = x
    for (w_ih, w_hh, b_ih, b_hh) in p["layers"]:
        h_prev = jnp.zeros((batch, HIDDEN), jnp.float32)
        c_prev = jnp.zeros((batch, HIDDEN), jnp.float32)
        gates = h @ w_ih.T + b_ih + h_prev @ w_hh.T + b_hh
        i, f, g, o = jnp.split(gates, 4, axis=-1)
        i, f, o = jax.nn.sigmoid(i), jax.nn.sigmoid(f), jax.nn.sigmoid(o)
        g = jnp.tanh(g)
        c = f * c_prev + i * g
        h = o * jnp.tanh(c)
    mean = jnp.mean(h, axis=-1, keepdims=True)
    var = jnp.mean((h - mean) ** 2, axis=-1, keepdims=True)
    h = (h - mean) / jnp.sqrt(var + LN_EPS) * p["ln_g"] + p["ln_b"]
    y = jnp.maximum(h @ p["w_fc1"].T + p["b_fc1"], 0.0)
    return y @ p["w_fc2"].T + p["b_fc2"]


if __name__ == "__main__":
    INPUT_SIZE = 64
    OUTPUT_SIZE = 8
    BATCH = 8

    key = jax.random.PRNGKey(0)
    kx, kp_key = jax.random.split(key)
    x = jax.random.normal(kx, (BATCH, INPUT_SIZE), jnp.float32)

    params = init_params(kp_key, INPUT_SIZE, OUTPUT_SIZE)
    kparams = to_kernel_params(params)

    out = jax.block_until_ready(lstm_salary_predict(x, kparams))

    ref = reference_forward(x, params)
    # bf16 weights + bf16 matmul inputs -> looser tolerance vs f32 reference.
    np.testing.assert_allclose(np.asarray(out), np.asarray(ref),
                               rtol=3e-2, atol=3e-2)
    print("KERNEL_OK")
</pallas_src>

<mosaic_0001>
module attributes {stable_mosaic.version = 11 : i64} {
  func.func @lstm_salary_kernel(%arg0: i32, %arg1: memref<8x64xf32, #tpu.memory_space<vmem>>, %arg2: memref<64x768xbf16, #tpu.memory_space<vmem>>, %arg3: memref<256x768xbf16, #tpu.memory_space<vmem>>, %arg4: memref<256x768xbf16, #tpu.memory_space<vmem>>, %arg5: memref<256x16xbf16, #tpu.memory_space<vmem>>, %arg6: memref<16x8xbf16, #tpu.memory_space<vmem>>, %arg7: memref<1x2560xf32, #tpu.memory_space<vmem>>, %arg8: memref<8x8xf32, #tpu.memory_space<vmem>>) attributes {dimension_semantics = [#tpu.dimension_semantics<parallel>], iteration_bounds = array<i64: 1>, scalar_prefetch = 0 : i64, scratch_operands = 0 : i64, tpu.core_type = #tpu.core_type<tc>, window_params = [{transform_indices = @transform_0, window_bounds = array<i64: 8, 64>}, {pipeline_mode = #tpu.pipeline_mode<synchronous>, transform_indices = @transform_1, window_bounds = array<i64: 64, 768>}, {pipeline_mode = #tpu.pipeline_mode<synchronous>, transform_indices = @transform_2, window_bounds = array<i64: 256, 768>}, {pipeline_mode = #tpu.pipeline_mode<synchronous>, transform_indices = @transform_3, window_bounds = array<i64: 256, 768>}, {pipeline_mode = #tpu.pipeline_mode<synchronous>, transform_indices = @transform_4, window_bounds = array<i64: 256, 16>}, {pipeline_mode = #tpu.pipeline_mode<synchronous>, transform_indices = @transform_5, window_bounds = array<i64: 16, 8>}, {pipeline_mode = #tpu.pipeline_mode<synchronous>, transform_indices = @transform_6, window_bounds = array<i64: 1, 2560>}, {transform_indices = @transform_7, window_bounds = array<i64: 8, 8>}]} {
    %c0 = arith.constant 0 : index
    %c0_0 = arith.constant 0 : index
    %0 = vector.load %arg7[%c0, %c0_0] : memref<1x2560xf32, #tpu.memory_space<vmem>>, vector<1x768xf32>
    %c0_1 = arith.constant 0 : index
    %c768 = arith.constant 768 : index
    %1 = vector.load %arg7[%c0_1, %c768] : memref<1x2560xf32, #tpu.memory_space<vmem>>, vector<1x768xf32>
    %c0_2 = arith.constant 0 : index
    %c1536 = arith.constant 1536 : index
    %2 = vector.load %arg7[%c0_2, %c1536] : memref<1x2560xf32, #tpu.memory_space<vmem>>, vector<1x768xf32>
    %c0_3 = arith.constant 0 : index
    %c0_4 = arith.constant 0 : index
    %3 = vector.load %arg1[%c0_3, %c0_4] : memref<8x64xf32, #tpu.memory_space<vmem>>, vector<8x64xf32>
    %c0_5 = arith.constant 0 : index
    %c0_6 = arith.constant 0 : index
    %4 = vector.load %arg2[%c0_5, %c0_6] : memref<64x768xbf16, #tpu.memory_space<vmem>>, vector<64x768xbf16>
    %5 = arith.truncf %3 : vector<8x64xf32> to vector<8x64xbf16>
    %cst = arith.constant dense<0.000000e+00> : vector<8x768xf32>
    %6 = tpu.matmul %5, %4, %cst {dimension_numbers = #tpu.dot_dimension_numbers<[1], [0], [0], [1], [0, 0, 1, 1], [], []>} : vector<8x64xbf16>, vector<64x768xbf16>, vector<8x768xf32> -> vector<8x768xf32>
    %7 = vector.broadcast %0 : vector<1x768xf32> to vector<8x768xf32>
    %8 = arith.addf %6, %7 : vector<8x768xf32>
    %9 = vector.extract_strided_slice %8 {offsets = [0, 0], sizes = [8, 256], strides = [1, 1]} : vector<8x768xf32> to vector<8x256xf32>
    %10 = arith.negf %9 : vector<8x256xf32>
    %11 = math.exp %10 : vector<8x256xf32>
    %cst_7 = arith.constant 1.000000e+00 : f32
    %12 = vector.broadcast %cst_7 : f32 to vector<8x256xf32>
    %13 = arith.addf %12, %11 : vector<8x256xf32>
    %14 = arith.divf %12, %13 : vector<8x256xf32>
    %15 = vector.extract_strided_slice %8 {offsets = [0, 256], sizes = [8, 256], strides = [1, 1]} : vector<8x768xf32> to vector<8x256xf32>
    %16 = math.tanh %15 : vector<8x256xf32>
    %17 = vector.extract_strided_slice %8 {offsets = [0, 512], sizes = [8, 256], strides = [1, 1]} : vector<8x768xf32> to vector<8x256xf32>
    %18 = arith.negf %17 : vector<8x256xf32>
    %19 = math.exp %18 : vector<8x256xf32>
    %cst_8 = arith.constant 1.000000e+00 : f32
    %20 = vector.broadcast %cst_8 : f32 to vector<8x256xf32>
    %21 = arith.addf %20, %19 : vector<8x256xf32>
    %22 = arith.divf %20, %21 : vector<8x256xf32>
    %23 = arith.mulf %14, %16 : vector<8x256xf32>
    %24 = math.tanh %23 : vector<8x256xf32>
    %25 = arith.mulf %22, %24 : vector<8x256xf32>
    %c0_9 = arith.constant 0 : index
    %c0_10 = arith.constant 0 : index
    %26 = vector.load %arg3[%c0_9, %c0_10] : memref<256x768xbf16, #tpu.memory_space<vmem>>, vector<256x768xbf16>
    %27 = arith.truncf %25 : vector<8x256xf32> to vector<8x256xbf16>
    %cst_11 = arith.constant dense<0.000000e+00> : vector<8x768xf32>
    %28 = tpu.matmul %27, %26, %cst_11 {dimension_numbers = #tpu.dot_dimension_numbers<[1], [0], [0], [1], [0, 0, 1, 1], [], []>} : vector<8x256xbf16>, vector<256x768xbf16>, vector<8x768xf32> -> vector<8x768xf32>
    %29 = vector.broadcast %1 : vector<1x768xf32> to vector<8x768xf32>
    %30 = arith.addf %28, %29 : vector<8x768xf32>
    %31 = vector.extract_strided_slice %30 {offsets = [0, 0], sizes = [8, 256], strides = [1, 1]} : vector<8x768xf32> to vector<8x256xf32>
    %32 = arith.negf %31 : vector<8x256xf32>
    %33 = math.exp %32 : vector<8x256xf32>
    %cst_12 = arith.constant 1.000000e+00 : f32
    %34 = vector.broadcast %cst_12 : f32 to vector<8x256xf32>
    %35 = arith.addf %34, %33 : vector<8x256xf32>
    %36 = arith.divf %34, %35 : vector<8x256xf32>
    %37 = vector.extract_strided_slice %30 {offsets = [0, 256], sizes = [8, 256], strides = [1, 1]} : vector<8x768xf32> to vector<8x256xf32>
    %38 = math.tanh %37 : vector<8x256xf32>
    %39 = vector.extract_strided_slice %30 {offsets = [0, 512], sizes = [8, 256], strides = [1, 1]} : vector<8x768xf32> to vector<8x256xf32>
    %40 = arith.negf %39 : vector<8x256xf32>
    %41 = math.exp %40 : vector<8x256xf32>
    %cst_13 = arith.constant 1.000000e+00 : f32
    %42 = vector.broadcast %cst_13 : f32 to vector<8x256xf32>
    %43 = arith.addf %42, %41 : vector<8x256xf32>
    %44 = arith.divf %42, %43 : vector<8x256xf32>
    %45 = arith.mulf %36, %38 : vector<8x256xf32>
    %46 = math.tanh %45 : vector<8x256xf32>
    %47 = arith.mulf %44, %46 : vector<8x256xf32>
    %c0_14 = arith.constant 0 : index
    %c0_15 = arith.constant 0 : index
    %48 = vector.load %arg4[%c0_14, %c0_15] : memref<256x768xbf16, #tpu.memory_space<vmem>>, vector<256x768xbf16>
    %49 = arith.truncf %47 : vector<8x256xf32> to vector<8x256xbf16>
    %cst_16 = arith.constant dense<0.000000e+00> : vector<8x768xf32>
    %50 = tpu.matmul %49, %48, %cst_16 {dimension_numbers = #tpu.dot_dimension_numbers<[1], [0], [0], [1], [0, 0, 1, 1], [], []>} : vector<8x256xbf16>, vector<256x768xbf16>, vector<8x768xf32> -> vector<8x768xf32>
    %51 = vector.broadcast %2 : vector<1x768xf32> to vector<8x768xf32>
    %52 = arith.addf %50, %51 : vector<8x768xf32>
    %53 = vector.extract_strided_slice %52 {offsets = [0, 0], sizes = [8, 256], strides = [1, 1]} : vector<8x768xf32> to vector<8x256xf32>
    %54 = arith.negf %53 : vector<8x256xf32>
    %55 = math.exp %54 : vector<8x256xf32>
    %cst_17 = arith.constant 1.000000e+00 : f32
    %56 = vector.broadcast %cst_17 : f32 to vector<8x256xf32>
    %57 = arith.addf %56, %55 : vector<8x256xf32>
    %58 = arith.divf %56, %57 : vector<8x256xf32>
    %59 = vector.extract_strided_slice %52 {offsets = [0, 256], sizes = [8, 256], strides = [1, 1]} : vector<8x768xf32> to vector<8x256xf32>
    %60 = math.tanh %59 : vector<8x256xf32>
    %61 = vector.extract_strided_slice %52 {offsets = [0, 512], sizes = [8, 256], strides = [1, 1]} : vector<8x768xf32> to vector<8x256xf32>
    %62 = arith.negf %61 : vector<8x256xf32>
    %63 = math.exp %62 : vector<8x256xf32>
    %cst_18 = arith.constant 1.000000e+00 : f32
    %64 = vector.broadcast %cst_18 : f32 to vector<8x256xf32>
    %65 = arith.addf %64, %63 : vector<8x256xf32>
    %66 = arith.divf %64, %65 : vector<8x256xf32>
    %67 = arith.mulf %58, %60 : vector<8x256xf32>
    %68 = math.tanh %67 : vector<8x256xf32>
    %69 = arith.mulf %66, %68 : vector<8x256xf32>
    %cst_19 = arith.constant dense<0.000000e+00> : vector<8xf32>
    %70 = vector.multi_reduction <add>, %69, %cst_19 [1] : vector<8x256xf32> to vector<8xf32>
    %71 = vector.shape_cast %70 : vector<8xf32> to vector<8x1xf32>
    %cst_20 = arith.constant 2.560000e+02 : f32
    %72 = vector.broadcast %cst_20 : f32 to vector<8x1xf32>
    %73 = arith.divf %71, %72 : vector<8x1xf32>
    %74 = vector.broadcast %73 : vector<8x1xf32> to vector<8x256xf32>
    %75 = arith.subf %69, %74 : vector<8x256xf32>
    %76 = arith.mulf %75, %75 : vector<8x256xf32>
    %cst_21 = arith.constant dense<0.000000e+00> : vector<8xf32>
    %77 = vector.multi_reduction <add>, %76, %cst_21 [1] : vector<8x256xf32> to vector<8xf32>
    %78 = vector.shape_cast %77 : vector<8xf32> to vector<8x1xf32>
    %cst_22 = arith.constant 2.560000e+02 : f32
    %79 = vector.broadcast %cst_22 : f32 to vector<8x1xf32>
    %80 = arith.divf %78, %79 : vector<8x1xf32>
    %cst_23 = arith.constant 9.99999974E-6 : f32
    %81 = vector.broadcast %cst_23 : f32 to vector<8x1xf32>
    %82 = arith.addf %80, %81 : vector<8x1xf32>
    %83 = math.rsqrt %82 : vector<8x1xf32>
    %84 = vector.broadcast %83 : vector<8x1xf32> to vector<8x256xf32>
    %85 = arith.mulf %75, %84 : vector<8x256xf32>
    %c0_24 = arith.constant 0 : index
    %c2304 = arith.constant 2304 : index
    %86 = vector.load %arg7[%c0_24, %c2304] : memref<1x2560xf32, #tpu.memory_space<vmem>>, vector<1x16xf32>
    %c0_25 = arith.constant 0 : index
    %c2432 = arith.constant 2432 : index
    %87 = vector.load %arg7[%c0_25, %c2432] : memref<1x2560xf32, #tpu.memory_space<vmem>>, vector<1x8xf32>
    %88 = arith.truncf %85 : vector<8x256xf32> to vector<8x256xbf16>
    %c0_26 = arith.constant 0 : index
    %c0_27 = arith.constant 0 : index
    %89 = vector.load %arg5[%c0_26, %c0_27] : memref<256x16xbf16, #tpu.memory_space<vmem>>, vector<256x16xbf16>
    %cst_28 = arith.constant dense<0.000000e+00> : vector<8x16xf32>
    %90 = tpu.matmul %88, %89, %cst_28 {dimension_numbers = #tpu.dot_dimension_numbers<[1], [0], [0], [1], [0, 0, 1, 1], [], []>} : vector<8x256xbf16>, vector<256x16xbf16>, vector<8x16xf32> -> vector<8x16xf32>
    %91 = vector.broadcast %86 : vector<1x16xf32> to vector<8x16xf32>
    %92 = arith.addf %90, %91 : vector<8x16xf32>
    %cst_29 = arith.constant 0.000000e+00 : f32
    %93 = vector.broadcast %cst_29 : f32 to vector<8x16xf32>
    %94 = arith.maximumf %92, %93 : vector<8x16xf32>
    %95 = arith.truncf %94 : vector<8x16xf32> to vector<8x16xbf16>
    %c0_30 = arith.constant 0 : index
    %c0_31 = arith.constant 0 : index
    %96 = vector.load %arg6[%c0_30, %c0_31] : memref<16x8xbf16, #tpu.memory_space<vmem>>, vector<16x8xbf16>
    %cst_32 = arith.constant dense<0.000000e+00> : vector<8x8xf32>
    %97 = tpu.matmul %95, %96, %cst_32 {dimension_numbers = #tpu.dot_dimension_numbers<[1], [0], [0], [1], [0, 0, 1, 1], [], []>} : vector<8x16xbf16>, vector<16x8xbf16>, vector<8x8xf32> -> vector<8x8xf32>
    %98 = vector.broadcast %87 : vector<1x8xf32> to vector<8x8xf32>
    %99 = arith.addf %97, %98 : vector<8x8xf32>
    %c0_33 = arith.constant 0 : index
    %c0_34 = arith.constant 0 : index
    %100 = vector.load %arg8[%c0_33, %c0_34] : memref<8x8xf32, #tpu.memory_space<vmem>>, vector<8x8xf32>
    tpu.vector_store %arg8[%c0_33, %c0_34], %99 {strides = array<i32>} : memref<8x8xf32, #tpu.memory_space<vmem>>, vector<8x8xf32>,
    return
  }
  func.func @transform_0(%arg0: i32) -> (i32, i32) {
    %c0_i32 = arith.constant 0 : i32
    %c0_i32_0 = arith.constant 0 : i32
    return %arg0, %c0_i32 : i32, i32
  }
  func.func @transform_1(%arg0: i32) -> (i32, i32) {
    %c0_i32 = arith.constant 0 : i32
    %c0_i32_0 = arith.constant 0 : i32
    %c0_i32_1 = arith.constant 0 : i32
    return %c0_i32, %c0_i32_0 : i32, i32
  }
  func.func @transform_2(%arg0: i32) -> (i32, i32) {
    %c0_i32 = arith.constant 0 : i32
    %c0_i32_0 = arith.constant 0 : i32
    %c0_i32_1 = arith.constant 0 : i32
    return %c0_i32, %c0_i32_0 : i32, i32
  }
  func.func @transform_3(%arg0: i32) -> (i32, i32) {
    %c0_i32 = arith.constant 0 : i32
    %c0_i32_0 = arith.constant 0 : i32
    %c0_i32_1 = arith.constant 0 : i32
    return %c0_i32, %c0_i32_0 : i32, i32
  }
  func.func @transform_4(%arg0: i32) -> (i32, i32) {
    %c0_i32 = arith.constant 0 : i32
    %c0_i32_0 = arith.constant 0 : i32
    %c0_i32_1 = arith.constant 0 : i32
    return %c0_i32, %c0_i32_0 : i32, i32
  }
  func.func @transform_5(%arg0: i32) -> (i32, i32) {
    %c0_i32 = arith.constant 0 : i32
    %c0_i32_0 = arith.constant 0 : i32
    %c0_i32_1 = arith.constant 0 : i32
    return %c0_i32, %c0_i32_0 : i32, i32
  }
  func.func @transform_6(%arg0: i32) -> (i32, i32) {
    %c0_i32 = arith.constant 0 : i32
    %c0_i32_0 = arith.constant 0 : i32
    %c0_i32_1 = arith.constant 0 : i32
    return %c0_i32, %c0_i32_0 : i32, i32
  }
  func.func @transform_7(%arg0: i32) -> (i32, i32) {
    %c0_i32 = arith.constant 0 : i32
    %c0_i32_0 = arith.constant 0 : i32
    return %arg0, %c0_i32 : i32, i32
  }
}

</mosaic_0001>

<bundles_post_ra>
// kernel: tpu_custom_call.1
= control target key start
LH: loop header
LB: loop body
LE: loop exit
PB: predicated region body
PF: predicated region fallthrough
CT: control target
= control target key end

     0   :  { %12 = vsyncpa [#allocation3], 0  ;;  %s3233_s0 = inlined_call_operand.vmem [shape: f32[8,64], index: 0, kind: input, shape index: {}]   ;;  %s3234_s1 = inlined_call_operand.hbm [shape: bf16[64,768], index: 1, kind: input, shape index: {}]   ;;  %s3235_s2 = inlined_call_operand.hbm [shape: bf16[256,768], index: 2, kind: input, shape index: {}]   ;;  %s3236_s3 = inlined_call_operand.hbm [shape: bf16[256,768], index: 3, kind: input, shape index: {}]   ;;  %s3237_s4 = inlined_call_operand.vmem [shape: bf16[256,16], index: 4, kind: input, shape index: {}]   ;;  %s3238_s5 = inlined_call_operand.vmem [shape: bf16[16,8], index: 5, kind: input, shape index: {}]   ;;  %s3239_s6 = inlined_call_operand.vmem [shape: f32[1,2560], index: 6, kind: input, shape index: {}]   ;;  %s3240_s7 = inlined_call_operand.hbm [shape: f32[8,8], index: 7, kind: output, shape index: {}]  }
   0x1   :  { %13 = vsyncpa [#allocation6], 0 }
   0x2   :  { %14 = vsyncpa [#allocation4], 0  ;;  %s3008_s24 = smov [#allocation5]   ;;  %s3009_s26 = smov [#allocation2]  }
   0x3   :  { %s34_s25 = sshll.u32 %s3008_s24, 4  ;;  %s22_s27 = sshll.u32 %s3009_s26, 4  ;;  %s35_s25 = int_to_ptr.vmem [resolvable:$true] %s34_s25  ;;  %s3057_s27 = int_to_ptr.vmem [resolvable:$true] %s22_s27 }
   0x4   :  { %s2914_s30 = scalar_lea.hbm %s3235_s2, 12288 }
   0x5   :  { %p2915_p0 = scmp.ne.s32.totalorder %s3235_s2, %s2914_s30  ;;  %p2918_p1 = scmp.lt.u32.totalorder %s2914_s30, %s3235_s2 }
   0x7   :  { %p2920_p2 = pnand %p2918_p1, %p2915_p0 }
   0x9   :  { %2923 = shalt.err (!%p2920_p2)
}
   0xa   :  { %s2924_s12 = scalar_lea.vmem %s35_s25, 12288  ;;  %p2929_p4 = scmp.lt.s32.totalorder %s35_s25, %s35_s25 }
   0xb   :  { %p2925_p3 = scmp.ne.s32.totalorder %s35_s25, %s2924_s12  ;;  %p2930_p5 = scmp.lt.s32.totalorder %s2924_s12, %s2924_s12 }
   0xd   :  { %p2931_p6 = por %p2930_p5, %p2929_p4 }
   0xf   :  { %p2932_p7 = pnand %p2931_p6, %p2925_p3 }
  0x11   :  { %2935 = shalt.err (!%p2932_p7)
}
  0x12   :  { %s3010_s13 = smov 384   ;;  %s3011_s14 = smov 24  }
  0x13   :  { %40 = dma.hbm_to_vmem [thread:$0]  %s3235_s2, 12288, %s35_s25, [#allocation6], %s3010_s13, %s3010_s13, %s3011_s14  }
  0x14   :  { %s2936_s19 = scalar_lea.hbm %s3234_s1, 3072 }
  0x15   :  { %p2937_p8 = scmp.ne.s32.totalorder %s3234_s1, %s2936_s19  ;;  %p2940_p9 = scmp.lt.u32.totalorder %s2936_s19, %s3234_s1 }
  0x17   :  { %p2942_p10 = pnand %p2940_p9, %p2937_p8 }
  0x19   :  { %2945 = shalt.err (!%p2942_p10)
}
  0x1a   :  { %s2946_s24 = scalar_lea.vmem %s3057_s27, 3072  ;;  %p2951_p12 = scmp.lt.s32.totalorder %s3057_s27, %s3057_s27 }
  0x1b   :  { %p2947_p11 = scmp.ne.s32.totalorder %s3057_s27, %s2946_s24  ;;  %p2952_p13 = scmp.lt.s32.totalorder %s2946_s24, %s2946_s24 }
  0x1d   :  { %p2953_p0 = por %p2952_p13, %p2951_p12 }
  0x1f   :  { %p2954_p1 = pnand %p2953_p0, %p2947_p11 }
  0x21   :  { %2957 = shalt.err (!%p2954_p1)
}
  0x22   :  { %28 = dma.hbm_to_vmem [thread:$0]  %s3234_s1, 3072, %s3057_s27, [#allocation3], %s3010_s13, %s3010_s13, %s3011_s14  }
  0x23   :  { %s3012_s26 = smov [#allocation7]   ;;  %s2958_s8 = scalar_lea.hbm %s3236_s3, 12288 }
  0x24   :  { %s46_s28 = sshll.u32 %s3012_s26, 4  ;;  %p2959_p2 = scmp.ne.s32.totalorder %s3236_s3, %s2958_s8  ;;  %s47_s28 = int_to_ptr.vmem [resolvable:$true] %s46_s28 }
  0x25   :  { %p2962_p3 = scmp.lt.u32.totalorder %s2958_s8, %s3236_s3 }
  0x27   :  { %p2964_p4 = pnand %p2962_p3, %p2959_p2 }
  0x29   :  { %2967 = shalt.err (!%p2964_p4)
}
  0x2a   :  { %s2968_s15 = scalar_lea.vmem %s47_s28, 12288  ;;  %p2973_p6 = scmp.lt.s32.totalorder %s47_s28, %s47_s28 }
  0x2b   :  { %p2969_p5 = scmp.ne.s32.totalorder %s47_s28, %s2968_s15  ;;  %p2974_p7 = scmp.lt.s32.totalorder %s2968_s15, %s2968_s15 }
  0x2d   :  { %p2975_p8 = por %p2974_p7, %p2973_p6 }
  0x2f   :  { %p2976_p9 = pnand %p2975_p8, %p2969_p5 }
  0x31   :  { %2979 = shalt.err (!%p2976_p9)
}
  0x32   :  { %52 = dma.hbm_to_vmem [thread:$0]  %s3236_s3, 12288, %s47_s28, [#allocation6], %s3010_s13, %s3010_s13, %s3011_s14  }
  0x33   :  { %3002 = dma.done.wait [#allocation3], 3072  }
  0x34   :  { %3003 = vsyncadd [#allocation3], 4294964224 }
  0x35   :  { %3004 = dma.done.wait [#allocation6], 24576  }
  0x36   :  { %3005 = vsyncadd [#allocation6], 4294942720  ;;  %v3013_v0 = vmov 0   ;;  %v2499_v1 = vld [vmem:[#allocation2 + $0x4] ss:$24 sps:$4 sm:$0xff]   ;;  %vm249_vm0 = vcmask 523264  }
  0x37   :  { %285 = vmatprep.mubr.bf16.mxu0 %v3013_v0  ;;  %326 = vmatprep.mubr.bf16.mxu1 %v3013_v0  ;;  %v2501_v2 = vld [vmem:[#allocation2] ss:$24 sps:$4 sm:$0xff]   ;;  %v2502_v3 = vld [vmem:[#allocation2 + $0x34] ss:$24 sps:$4 sm:$0xff]   ;;  %v2504_v4 = vld [vmem:[#allocation2 + $0x30] ss:$24 sps:$4 sm:$0xff]  }
  0x38   :  { %253 = vmatprep.subr.bf16.mxu0 %v2499_v1  ;;  %v2505_v5 = vld [vmem:[#allocation2 + $0x64] ss:$24 sps:$4 sm:$0xff]   ;;  %v2513_v7 = vld [vmem:[#allocation2 + $0x8] ss:$24 sps:$4 sm:$0xff]   ;;  %v2508_v9 = vld [vmem:[#allocation2 + $0x94] ss:$24 sps:$4 sm:$0xff]  }
  0x39   :  { %254 = vmatpush1.bf16.msra.mxu0 %v2501_v2  ;;  %v2511_v6 = vld [vmem:[#allocation2 + $0xc] ss:$24 sps:$4 sm:$0xff]   ;;  %v2507_v8 = vld [vmem:[#allocation2 + $0x60] ss:$24 sps:$4 sm:$0xff]   ;;  %v2517_v10 = vld [vmem:[#allocation2 + $0x3c] ss:$24 sps:$4 sm:$0xff]  }
  0x3a   :  { %255 = vmatprep.subr.bf16.mxu0 %v2502_v3  ;;  %294 = vmatprep.subr.bf16.mxu1 %v2511_v6  ;;  %v2519_v11 = vld [vmem:[#allocation2 + $0x38] ss:$24 sps:$4 sm:$0xff]   ;;  %v72_v13 = vld [vmem:[%s3233_s0] sm:$0xff]  ;;  %v2516_v15 = vld [vmem:[#allocation2 + $0x14] ss:$24 sps:$4 sm:$0xff]   ;;  %vm3015_vm1 = vmmov 0  }
  0x3b   :  { %295 = vmatpush1.bf16.msra.mxu1 %v2513_v7  ;;  %v2510_v12 = vld [vmem:[#allocation2 + $0x90] ss:$24 sps:$4 sm:$0xff]   ;;  %v2523_v14 = vld [vmem:[#allocation2 + $0x6c] ss:$24 sps:$4 sm:$0xff]   ;;  %v97_v17 = vpack.c.bf16 %v72_v13, %v72_v13  ;;  %v2529_v18 = vld [vmem:[#allocation2 + $0x9c] ss:$24 sps:$4 sm:$0xff]  }
  0x3c   :  { %296 = vmatprep.subr.bf16.mxu1 %v2517_v10  ;;  %v2525_v16 = vld [vmem:[#allocation2 + $0x68] ss:$24 sps:$4 sm:$0xff]   ;;  %v2522_v20 = vld [vmem:[#allocation2 + $0x44] ss:$24 sps:$4 sm:$0xff]   ;;  %v2531_v21 = vld [vmem:[#allocation2 + $0x98] ss:$24 sps:$4 sm:$0xff]  }
  0x3d   :  { %256 = vmatpush1.bf16.msra.mxu0 %v2504_v4  ;;  %v2514_v19 = vld [vmem:[#allocation2 + $0x10] ss:$24 sps:$4 sm:$0xff]   ;;  %v2537_v22 = vld [vmem:[#allocation5 + $0x4] ss:$24 sps:$4 sm:$0xff]   ;;  %v2520_v23 = vld [vmem:[#allocation2 + $0x40] ss:$24 sps:$4 sm:$0xff]  }
  0x3e   :  { %257 = vmatprep.subr.bf16.mxu0 %v2505_v5  ;;  %v2528_v24 = vld [vmem:[#allocation2 + $0x74] ss:$24 sps:$4 sm:$0xff]   ;;  %v2535_v25 = vld [vmem:[#allocation5] ss:$24 sps:$4 sm:$0xff]   ;;  %v2526_v27 = vld [vmem:[#allocation2 + $0x70] ss:$24 sps:$4 sm:$0xff]  }
  0x3f   :  { %297 = vmatpush1.bf16.msra.mxu1 %v2519_v11  ;;  %v2543_v26 = vld [vmem:[#allocation5 + $0x34] ss:$24 sps:$4 sm:$0xff]   ;;  %v2534_v28 = vld [vmem:[#allocation2 + $0xa4] ss:$24 sps:$4 sm:$0xff]   ;;  %v2532_v29 = vld [vmem:[#allocation2 + $0xa0] ss:$24 sps:$4 sm:$0xff]  }
  0x40   :  { %298 = vmatprep.subr.bf16.mxu1 %v2523_v14  ;;  %v2541_v30 = vld [vmem:[#allocation5 + $0x30] ss:$24 sps:$4 sm:$0xff]   ;;  %v2540_v31 = vld [vmem:[#allocation5 + $0xc] ss:$24 sps:$4 sm:$0xff]   ;;  %v2547_v33 = vld [vmem:[#allocation5 + $0x60] ss:$24 sps:$4 sm:$0xff]  }
  0x41   :  { %258 = vmatpush1.bf16.msra.mxu0 %v2507_v8  ;;  %v2549_v32 = vld [vmem:[#allocation5 + $0x64] ss:$24 sps:$4 sm:$0xff]   ;;  %v2555_v34 = vld [vmem:[#allocation5 + $0x94] ss:$24 sps:$4 sm:$0xff]   ;;  %v2538_v35 = vld [vmem:[#allocation5 + $0x8] ss:$24 sps:$4 sm:$0xff]  }
  0x42   :  { %259 = vmatprep.subr.bf16.mxu0 %v2508_v9  ;;  %v2546_v36 = vld [vmem:[#allocation5 + $0x3c] ss:$24 sps:$4 sm:$0xff]   ;;  %v2553_v37 = vld [vmem:[#allocation5 + $0x90] ss:$24 sps:$4 sm:$0xff]   ;;  %v2552_v39 = vld [vmem:[#allocation5 + $0x6c] ss:$24 sps:$4 sm:$0xff]  }
  0x43   :  { %299 = vmatpush1.bf16.msra.mxu1 %v2525_v16  ;;  %v2544_v38 = vld [vmem:[#allocation5 + $0x38] ss:$24 sps:$4 sm:$0xff]   ;;  %v2550_v40 = vld [vmem:[#allocation5 + $0x68] ss:$24 sps:$4 sm:$0xff]   ;;  %v2558_v41 = vld [vmem:[#allocation5 + $0x9c] ss:$24 sps:$4 sm:$0xff]  }
  0x44   :  { %300 = vmatprep.subr.bf16.mxu1 %v2529_v18  ;;  %v2556_v42 = vld [vmem:[#allocation5 + $0x98] ss:$24 sps:$4 sm:$0xff]   ;;  %v2561_v43 = vld [vmem:[#allocation5 + $0xc4] ss:$24 sps:$4 sm:$0xff]   ;;  %v2562_v46 = vld [vmem:[#allocation5 + $0xc8] ss:$24 sps:$4 sm:$0xff]  }
  0x45   :  { %260 = vmatpush1.bf16.msra.mxu0 %v2510_v12  ;;  %v2559_v44 = vld [vmem:[#allocation5 + $0xc0] ss:$24 sps:$4 sm:$0xff]   ;;  %v2564_v45 = vld [vmem:[#allocation5 + $0xcc] ss:$24 sps:$4 sm:$0xff]   ;;  %v2565_v48 = vld [vmem:[#allocation5 + $0xf0] ss:$24 sps:$4 sm:$0xff]  }
  0x46   :  { %335 = vmatprep.subr.bf16.mxu0 %v2516_v15  ;;  %v2567_v47 = vld [vmem:[#allocation5 + $0xf4] ss:$24 sps:$4 sm:$0xff]   ;;  %v2568_v50 = vld [vmem:[#allocation5 + $0xf8] ss:$24 sps:$4 sm:$0xff]   ;;  %v2573_v51 = vld [vmem:[#allocation5 + $0x124] ss:$24 sps:$4 sm:$0xff]  }
  0x47   :  { %301 = vmatpush1.bf16.msra.mxu1 %v2531_v21  ;;  %v2570_v49 = vld [vmem:[#allocation5 + $0xfc] ss:$24 sps:$4 sm:$0xff]   ;;  %v2571_v52 = vld [vmem:[#allocation5 + $0x120] ss:$24 sps:$4 sm:$0xff]   ;;  %v2576_v53 = vld [vmem:[#allocation5 + $0x12c] ss:$24 sps:$4 sm:$0xff]  }
  0x48   :  { %2233 = vmatmul.mubr.msk.bf16.vlgmr.msra.gmra.mrb[0].mxu0 %vm249_vm0, %v97_v17  ;;  %1017 = vmatprep.subr.bf16.mxu1 %v2537_v22  ;;  %v2574_v54 = vld [vmem:[#allocation5 + $0x128] ss:$24 sps:$4 sm:$0xff]   ;;  %v2579_v55 = vld [vmem:[#allocation5 + $0x154] ss:$24 sps:$4 sm:$0xff]   ;;  %v2580_v58 = vld [vmem:[#allocation5 + $0x158] ss:$24 sps:$4 sm:$0xff]  }
  0x49   :  { %336 = vmatpush1.bf16.msra.mxu0 %v2514_v19  ;;  %367 = vmatprep.mubr.bf16.mxu0 %v3013_v0  ;;  %v2577_v56 = vld [vmem:[#allocation5 + $0x150] ss:$24 sps:$4 sm:$0xff]   ;;  %v2582_v57 = vld [vmem:[#allocation5 + $0x15c] ss:$24 sps:$4 sm:$0xff]   ;;  %v2583_v60 = vld [vmem:[#allocation5 + $0x180] ss:$24 sps:$4 sm:$0xff]  }
  0x4a   :  { %337 = vmatprep.subr.bf16.mxu0 %v2522_v20  ;;  %2234 = vmatmul.mubr.msk.bf16.vlgmr.msra.gmra.mrb[0].mxu1 %vm249_vm0, %v97_v17  ;;  %v2585_v59 = vld [vmem:[#allocation5 + $0x184] ss:$24 sps:$4 sm:$0xff]   ;;  %v2586_v62 = vld [vmem:[#allocation5 + $0x188] ss:$24 sps:$4 sm:$0xff]   ;;  %v2591_v63 = vld [vmem:[#allocation5 + $0x1b4] ss:$24 sps:$4 sm:$0xff]  }
  0x4b   :  { %1018 = vmatpush1.bf16.msra.mxu1 %v2535_v25  ;;  %v2588_v61 = vld [vmem:[#allocation5 + $0x18c] ss:$24 sps:$4 sm:$0xff]   ;;  %v2589_v0 = vld [vmem:[#allocation5 + $0x1b0] ss:$24 sps:$4 sm:$0xff]   ;;  %v2594_v1 = vld [vmem:[#allocation5 + $0x1bc] ss:$24 sps:$4 sm:$0xff]  }
  0x4c   :  { %1019 = vmatprep.subr.bf16.mxu1 %v2543_v26  ;;  %v2592_v2 = vld [vmem:[#allocation5 + $0x1b8] ss:$24 sps:$4 sm:$0xff]   ;;  %v2597_v3 = vld [vmem:[#allocation5 + $0x1e4] ss:$24 sps:$4 sm:$0xff]   ;;  %v2598_v6 = vld [vmem:[#allocation5 + $0x1e8] ss:$24 sps:$4 sm:$0xff]  }
  0x4d   :  { %338 = vmatpush1.bf16.msra.mxu0 %v2520_v23  ;;  %v2595_v4 = vld [vmem:[#allocation5 + $0x1e0] ss:$24 sps:$4 sm:$0xff]   ;;  %v2600_v5 = vld [vmem:[#allocation5 + $0x1ec] ss:$24 sps:$4 sm:$0xff]   ;;  %v2601_v8 = vld [vmem:[#allocation5 + $0x210] ss:$24 sps:$4 sm:$0xff]  }
  0x4e   :  { %339 = vmatprep.subr.bf16.mxu0 %v2528_v24  ;;  %v2603_v7 = vld [vmem:[#allocation5 + $0x214] ss:$24 sps:$4 sm:$0xff]   ;;  %v2604_v10 = vld [vmem:[#allocation5 + $0x218] ss:$24 sps:$4 sm:$0xff]   ;;  %v2609_v11 = vld [vmem:[#allocation5 + $0x244] ss:$24 sps:$4 sm:$0xff]  }
  0x4f   :  { %1020 = vmatpush1.bf16.msra.mxu1 %v2541_v30  ;;  %v2606_v9 = vld [vmem:[#allocation5 + $0x21c] ss:$24 sps:$4 sm:$0xff]   ;;  %v2607_v12 = vld [vmem:[#allocation5 + $0x240] ss:$24 sps:$4 sm:$0xff]   ;;  %v2612_v13 = vld [vmem:[#allocation5 + $0x24c] ss:$24 sps:$4 sm:$0xff]  }
  0x50   :  { %1021 = vmatprep.subr.bf16.mxu1 %v2549_v32  ;;  %v2610_v14 = vld [vmem:[#allocation5 + $0x248] ss:$24 sps:$4 sm:$0xff]   ;;  %v2615_v16 = vld [vmem:[#allocation5 + $0x274] ss:$24 sps:$4 sm:$0xff]   ;;  %v2621_v19 = vld [vmem:[#allocation5 + $0x2a4] ss:$24 sps:$4 sm:$0xff]  }
  0x51   :  { %340 = vmatpush1.bf16.msra.mxu0 %v2526_v27  ;;  %v2613_v15 = vld [vmem:[#allocation5 + $0x270] ss:$24 sps:$4 sm:$0xff]   ;;  %v2618_v18 = vld [vmem:[#allocation5 + $0x27c] ss:$24 sps:$4 sm:$0xff]   ;;  %v2624_v20 = vld [vmem:[#allocation5 + $0x2ac] ss:$24 sps:$4 sm:$0xff]  }
  0x52   :  { %341 = vmatprep.subr.bf16.mxu0 %v2534_v28  ;;  %v2619_v21 = vld [vmem:[#allocation5 + $0x2a0] ss:$24 sps:$4 sm:$0xff]   ;;  %v2627_v23 = vld [vmem:[#allocation5 + $0x2d4] ss:$24 sps:$4 sm:$0xff]   ;;  %v2625_v25 = vld [vmem:[#allocation5 + $0x2d0] ss:$24 sps:$4 sm:$0xff]   ;;  %v99_v28 = vlaneseq }
  0x53   :  { %1022 = vmatpush1.bf16.msra.mxu1 %v2547_v33  ;;  %v2622_v22 = vld [vmem:[#allocation5 + $0x2a8] ss:$24 sps:$4 sm:$0xff]   ;;  %v2630_v24 = vld [vmem:[#allocation5 + $0x2dc] ss:$24 sps:$4 sm:$0xff]   ;;  %v2628_v26 = vld [vmem:[#allocation5 + $0x2d8] ss:$24 sps:$4 sm:$0xff]  }
  0x54   :  { %1023 = vmatprep.subr.bf16.mxu1 %v2555_v34  ;;  %v2633_v27 = vld [vmem:[#allocation5 + $0x14] ss:$24 sps:$4 sm:$0xff]   ;;  %vm2147_vm2 = vcmask 130048   ;;  %s3016_s29 = smov [#allocation8]   ;;  %vm2191_vm3 = vcmask 64512  }
  0x55   :  { %342 = vmatpush1.bf16.msra.mxu0 %v2532_v29  ;;  %v100_v29 = vshrl.u32 %v99_v28, 7  ;;  %v2642_v28 = vld [vmem:[#allocation5 + $0xa4] ss:$24 sps:$4 sm:$0xff]   ;;  %s2199_s30 = sshll.u32 %s3016_s29, 4  ;;  %s2200_s30 = int_to_ptr.vmem [resolvable:$true] %s2199_s30 }
  0x56   :  { %1058 = vmatprep.subr.bf16.mxu0 %v2540_v31  ;;  %v69_v31 = vld [vmem:[%s3239_s6] sm:$0x3f]  ;;  %s2980_s8 = scalar_lea.vmem %s2200_s30, 128  ;;  %p2985_p11 = scmp.lt.s32.totalorder %s2200_s30, %s2200_s30 }
  0x57   :  { %1024 = vmatpush1.bf16.msra.mxu1 %v2553_v37  ;;  %v3115_v30 = vsub.s32 0, %v100_v29  ;;  %v3120_v32 = vsub.s32 1, %v100_v29  ;;  %p2981_p10 = scmp.ne.s32.totalorder %s2200_s30, %s2980_s8  ;;  %p2986_p12 = scmp.lt.s32.totalorder %s2980_s8, %s2980_s8 }
  0x58   :  { %2235 = vmatmul.mubr.msk.bf16.vlgmr.msra.gmra.mrb[4].mxu0 %vm249_vm0, %v97_v17  ;;  %1025 = vmatprep.subr.bf16.mxu1 %v2561_v43  ;;  %v2616_v17 = vld [vmem:[#allocation5 + $0x278] ss:$24 sps:$4 sm:$0xff]   ;;  %v3124_v43 = vsub.s32 2, %v100_v29 }
  0x59   :  { %1059 = vmatpush1.bf16.msra.mxu0 %v2538_v35  ;;  %v102_v33 = vrot.slane %v69_v31, %v3115_v30  ;;  %v106_v34 = vrot.slane %v69_v31, %v3120_v32  ;;  %p2987_p13 = por %p2986_p12, %p2985_p11 }
  0x5a   :  { %1060 = vmatprep.subr.bf16.mxu0 %v2546_v36 }
  0x5b   :  { %1026 = vmatpush1.bf16.msra.mxu1 %v2559_v44  ;;  %v3126_v44 = vsub.s32 3, %v100_v29  ;;  %p2988_p0 = pnand %p2987_p13, %p2981_p10 }
  0x5c   :  { %1027 = vmatprep.subr.bf16.mxu1 %v2567_v47  ;;  %v110_v47 = vrot.slane %v69_v31, %v3124_v43 }
  0x5d   :  { %1061 = vmatpush1.bf16.msra.mxu0 %v2544_v38 }
  0x5e   :  { %1062 = vmatprep.subr.bf16.mxu0 %v2552_v39 }
  0x5f   :  { %1028 = vmatpush1.bf16.msra.mxu1 %v2565_v48 }
  0x60   :  { %1029 = vmatprep.subr.bf16.mxu1 %v2573_v51 }
  0x61   :  { %1063 = vmatpush1.bf16.msra.mxu0 %v2550_v40 }
  0x62   :  { %1064 = vmatprep.subr.bf16.mxu0 %v2558_v41 }
  0x63   :  { %1030 = vmatpush1.bf16.msra.mxu1 %v2571_v52  ;;  %v3132_v52 = vsub.s32 5, %v100_v29 }
  0x64   :  { %1031 = vmatprep.subr.bf16.mxu1 %v2579_v55 }
  0x65   :  { %1065 = vmatpush1.bf16.msra.mxu0 %v2556_v42 }
  0x66   :  { %1066 = vmatprep.subr.bf16.mxu0 %v2564_v45 }
  0x67   :  { %1032 = vmatpush1.bf16.msra.mxu1 %v2577_v56  ;;  %v122_v56 = vrot.slane %v69_v31, %v3132_v52 }
  0x68   :  { %1033 = vmatprep.subr.bf16.mxu1 %v2585_v59 }
  0x69   :  { %1067 = vmatpush1.bf16.msra.mxu0 %v2562_v46 }
  0x6a   :  { %1068 = vmatprep.subr.bf16.mxu0 %v2570_v49  ;;  %v114_v49 = vrot.slane %v69_v31, %v3126_v44 }
  0x6b   :  { %1034 = vmatpush1.bf16.msra.mxu1 %v2583_v60 }
  0x6c   :  { %1035 = vmatprep.subr.bf16.mxu1 %v2591_v63 }
  0x6d   :  { %1069 = vmatpush1.bf16.msra.mxu0 %v2568_v50  ;;  %v3130_v50 = vsub.s32 4, %v100_v29  ;;  %v2640_v29 = vld [vmem:[#allocation5 + $0xa0] ss:$24 sps:$4 sm:$0xff]  }
  0x6e   :  { %1070 = vmatprep.subr.bf16.mxu0 %v2576_v53 }
  0x6f   :  { %1036 = vmatpush1.bf16.msra.mxu1 %v2589_v0  ;;  %v118_v55 = vrot.slane %v69_v31, %v3130_v50  ;;  %v2645_v31 = vld [vmem:[#allocation5 + $0xd4] ss:$24 sps:$4 sm:$0xff]  }
  0x70   :  { %1037 = vmatprep.subr.bf16.mxu1 %v2597_v3 }
  0x71   :  { %1071 = vmatpush1.bf16.msra.mxu0 %v2574_v54 }
  0x72   :  { %1072 = vmatprep.subr.bf16.mxu0 %v2582_v57 }
  0x73   :  { %1038 = vmatpush1.bf16.msra.mxu1 %v2595_v4 }
  0x74   :  { %1039 = vmatprep.subr.bf16.mxu1 %v2603_v7 }
  0x75   :  { %1073 = vmatpush1.bf16.msra.mxu0 %v2580_v58 }
  0x76   :  { %1074 = vmatprep.subr.bf16.mxu0 %v2588_v61 }
  0x77   :  { %1040 = vmatpush1.bf16.msra.mxu1 %v2601_v8 }
  0x78   :  { %1041 = vmatprep.subr.bf16.mxu1 %v2609_v11 }
  0x79   :  { %1075 = vmatpush1.bf16.msra.mxu0 %v2586_v62 }
  0x7a   :  { %1076 = vmatprep.subr.bf16.mxu0 %v2594_v1 }
  0x7b   :  { %1042 = vmatpush1.bf16.msra.mxu1 %v2607_v12 }
  0x7c   :  { %1043 = vmatprep.subr.bf16.mxu1 %v2615_v16 }
  0x7d   :  { %1077 = vmatpush1.bf16.msra.mxu0 %v2592_v2 }
  0x7e   :  { %1078 = vmatprep.subr.bf16.mxu0 %v2600_v5 }
  0x7f   :  { %1044 = vmatpush1.bf16.msra.mxu1 %v2613_v15 }
  0x80   :  { %1045 = vmatprep.subr.bf16.mxu1 %v2621_v19 }
  0x81   :  { %1079 = vmatpush1.bf16.msra.mxu0 %v2598_v6 }
  0x82   :  { %1080 = vmatprep.subr.bf16.mxu0 %v2606_v9 }
  0x83   :  { %1046 = vmatpush1.bf16.msra.mxu1 %v2619_v21 }
  0x84   :  { %1047 = vmatprep.subr.bf16.mxu1 %v2627_v23 }
  0x85   :  { %1081 = vmatpush1.bf16.msra.mxu0 %v2604_v10 }
  0x86   :  { %1082 = vmatprep.subr.bf16.mxu0 %v2612_v13 }
  0x87   :  { %1048 = vmatpush1.bf16.msra.mxu1 %v2625_v25  ;;  %v2634_v25 = vld [vmem:[#allocation5 + $0x40] ss:$24 sps:$4 sm:$0xff]  }
  0x88   :  { %1099 = vmatprep.subr.bf16.mxu1 %v2633_v27  ;;  %v2637_v27 = vld [vmem:[#allocation5 + $0x70] ss:$24 sps:$4 sm:$0xff]  }
  0x89   :  { %1083 = vmatpush1.bf16.msra.mxu0 %v2610_v14 }
  0x8a   :  { %1084 = vmatprep.subr.bf16.mxu0 %v2618_v18 }
  0x8d   :  { %1085 = vmatpush1.bf16.msra.mxu0 %v2616_v17 }
  0x8e   :  { %1086 = vmatprep.subr.bf16.mxu0 %v2624_v20 }
  0x91   :  { %1087 = vmatpush1.bf16.msra.mxu0 %v2622_v22  ;;  %v2631_v22 = vld [vmem:[#allocation5 + $0x10] ss:$24 sps:$4 sm:$0xff]  }
  0x92   :  { %1088 = vmatprep.subr.bf16.mxu0 %v2630_v24  ;;  %v2636_v24 = vld [vmem:[#allocation5 + $0x44] ss:$24 sps:$4 sm:$0xff]  }
  0x95   :  { %1089 = vmatpush1.bf16.msra.mxu0 %v2628_v26  ;;  %v2639_v26 = vld [vmem:[#allocation5 + $0x74] ss:$24 sps:$4 sm:$0xff]  }
 0x11b   :  { %v287_v35 = vpop.f32.mrb[0].mxu0 }
 0x11c   :  { %v288_v36 = vadd.f32 %v287_v35, %v102_v33  ;;  %v289_v37 = vpop.f32.mrb[1].mxu0  ;;  %v2643_v33 = vld [vmem:[#allocation5 + $0xd0] ss:$24 sps:$4 sm:$0xff]   ;;  %v2646_v35 = vld [vmem:[#allocation5 + $0x100] ss:$24 sps:$4 sm:$0xff]  }
 0x11d   :  { %v290_v38 = vadd.f32 %v289_v37, %v106_v34  ;;  %v291_v39 = vpop.f32.mrb[2].mxu0  ;;  %v328_v45 = vpop.f32.mrb[0].mxu1  ;;  %v2648_v34 = vld [vmem:[#allocation5 + $0x104] ss:$24 sps:$4 sm:$0xff]   ;;  %v2649_v37 = vld [vmem:[#allocation5 + $0x130] ss:$24 sps:$4 sm:$0xff]  }
 0x11e   :  { %v2236_v40 = vmul.f32 -1.442695, %v288_v36  ;;  %v292_v41 = vpop.f32.mrb[3].mxu0  ;;  %v330_v46 = vpop.f32.mrb[1].mxu1  ;;  %v329_v53 = vadd.f32 %v328_v45, %v110_v47  ;;  %v2651_v36 = vld [vmem:[#allocation5 + $0x134] ss:$24 sps:$4 sm:$0xff]  }
 0x11f   :  { %v2237_v42 = vmul.f32 -1.442695, %v290_v38  ;;  %v332_v48 = vpop.f32.mrb[2].mxu1  ;;  %v331_v54 = vadd.f32 %v330_v46, %v114_v49  ;;  %v2654_v38 = vld [vmem:[#allocation5 + $0x164] ss:$24 sps:$4 sm:$0xff]  }
 0x120   :  { %2840 = vpow2.f32 %v2236_v40  ;;  %v333_v51 = vpop.f32.mrb[3].mxu1  ;;  %v2652_v39 = vld [vmem:[#allocation5 + $0x160] ss:$24 sps:$4 sm:$0xff]   ;;  %v2657_v40 = vld [vmem:[#allocation5 + $0x194] ss:$24 sps:$4 sm:$0xff]  }
 0x121   :  { %2842 = vpow2.f32 %v2237_v42  ;;  %v2655_v41 = vld [vmem:[#allocation5 + $0x190] ss:$24 sps:$4 sm:$0xff]   ;;  %v2660_v42 = vld [vmem:[#allocation5 + $0x1c4] ss:$24 sps:$4 sm:$0xff]   ;;  %v2658_v45 = vld [vmem:[#allocation5 + $0x1c0] ss:$24 sps:$4 sm:$0xff]  }
 0x122   :  { %2844 = vtanh.f32 %v329_v53  ;;  %v2663_v46 = vld [vmem:[#allocation5 + $0x1f4] ss:$24 sps:$4 sm:$0xff]   ;;  %v2661_v47 = vld [vmem:[#allocation5 + $0x1f0] ss:$24 sps:$4 sm:$0xff]   ;;  %v2666_v48 = vld [vmem:[#allocation5 + $0x224] ss:$24 sps:$4 sm:$0xff]  }
 0x123   :  { %2846 = vtanh.f32 %v331_v54  ;;  %v2664_v49 = vld [vmem:[#allocation5 + $0x220] ss:$24 sps:$4 sm:$0xff]   ;;  %v2669_v51 = vld [vmem:[#allocation5 + $0x254] ss:$24 sps:$4 sm:$0xff]   ;;  %v2667_v53 = vld [vmem:[#allocation5 + $0x250] ss:$24 sps:$4 sm:$0xff]  }
 0x124   :  { %v2672_v54 = vld [vmem:[#allocation5 + $0x284] ss:$24 sps:$4 sm:$0xff]  }
 0x12a   :  { %v2841_v57 = vpop.eup %2840 }
 0x12b   :  { %v2843_v58 = vpop.eup %2842  ;;  %v382_v59 = vadd.f32 1.0, %v2841_v57  ;;  %v369_v60 = vpop.f32.mrb[4].mxu0  ;;  %v2673_v57 = vld [vmem:[#allocation5 + $0x2b0] ss:$24 sps:$4 sm:$0xff]  }
 0x12c   :  { %v383_v61 = vadd.f32 1.0, %v2843_v58  ;;  %v370_v62 = vadd.f32 %v369_v60, %v118_v55  ;;  %v371_v63 = vpop.f32.mrb[5].mxu0  ;;  %v2845_v5 = vpop.eup %2844  ;;  %v2670_v55 = vld [vmem:[#allocation5 + $0x280] ss:$24 sps:$4 sm:$0xff]   ;;  %v2678_v58 = vld [vmem:[#allocation5 + $0x2e4] ss:$24 sps:$4 sm:$0xff]  }
 0x12d   :  { %2848 = vrcp.f32 %v382_v59  ;;  %v372_v0 = vadd.f32 %v371_v63, %v122_v56  ;;  %v373_v1 = vpop.f32.mrb[6].mxu0  ;;  %v2847_v6 = vpop.eup %2846  ;;  %v2675_v56 = vld [vmem:[#allocation5 + $0x2b4] ss:$24 sps:$4 sm:$0xff]   ;;  %v2676_v59 = vld [vmem:[#allocation5 + $0x2e0] ss:$24 sps:$4 sm:$0xff]  }
 0x12e   :  { %2850 = vrcp.f32 %v383_v61  ;;  %v2238_v2 = vmul.f32 -1.442695, %v370_v62  ;;  %v374_v3 = vpop.f32.mrb[7].mxu0  ;;  %v2679_v60 = vld [vmem:[#allocation7] ss:$24 sps:$4 sm:$0xff]  }
 0x12f   :  { %v2239_v4 = vmul.f32 -1.442695, %v372_v0  ;;  %v2681_v61 = vld [vmem:[#allocation7 + $0x4] ss:$24 sps:$4 sm:$0xff]   ;;  %v2682_v62 = vld [vmem:[#allocation7 + $0x8] ss:$24 sps:$4 sm:$0xff]  }
 0x130   :  { %2852 = vpow2.f32 %v2238_v2  ;;  %v2684_v63 = vld [vmem:[#allocation7 + $0xc] ss:$24 sps:$4 sm:$0xff]   ;;  %1781 = vmatprep.subr.bf16.mxu0 %v2681_v61  ;;  %v2690_v1 = vld [vmem:[#allocation7 + $0x3c] ss:$24 sps:$4 sm:$0xff]   ;;  %v2685_v2 = vld [vmem:[#allocation7 + $0x30] ss:$24 sps:$4 sm:$0xff]  }
 0x131   :  { %2854 = vpow2.f32 %v2239_v4  ;;  %v2687_v0 = vld [vmem:[#allocation7 + $0x34] ss:$24 sps:$4 sm:$0xff]   ;;  %v2688_v3 = vld [vmem:[#allocation7 + $0x38] ss:$24 sps:$4 sm:$0xff]   ;;  %v2693_v4 = vld [vmem:[#allocation7 + $0x64] ss:$24 sps:$4 sm:$0xff]  }
 0x132   :  { %v2766_v61 = vld [vmem:[#allocation7 + $0x2a8] ss:$24 sps:$4 sm:$0xff]  }
 0x137   :  { %v2849_v7 = vpop.eup %2848 }
 0x138   :  { %v2851_v8 = vpop.eup %2850  ;;  %v402_v9 = vmul.f32 %v2849_v7, %v2845_v5  ;;  %v2696_v5 = vld [vmem:[#allocation7 + $0x6c] ss:$24 sps:$4 sm:$0xff]   ;;  %v2694_v7 = vld [vmem:[#allocation7 + $0x68] ss:$24 sps:$4 sm:$0xff]  }
 0x139   :  { %v403_v10 = vmul.f32 %v2851_v8, %v2847_v6  ;;  %v2691_v6 = vld [vmem:[#allocation7 + $0x60] ss:$24 sps:$4 sm:$0xff]   ;;  %v2699_v8 = vld [vmem:[#allocation7 + $0x94] ss:$24 sps:$4 sm:$0xff]  }
 0x13a   :  { %v2853_v11 = vpop.eup %2852  ;;  %2856 = vtanh.f32 %v402_v9  ;;  %v2702_v9 = vld [vmem:[#allocation7 + $0x9c] ss:$24 sps:$4 sm:$0xff]  }
 0x13b   :  { %v2855_v12 = vpop.eup %2854  ;;  %v396_v13 = vadd.f32 1.0, %v2853_v11  ;;  %2858 = vtanh.f32 %v403_v10  ;;  %v2697_v10 = vld [vmem:[#allocation7 + $0x90] ss:$24 sps:$4 sm:$0xff]  }
 0x13c   :  { %v397_v14 = vadd.f32 1.0, %v2855_v12  ;;  %v2700_v11 = vld [vmem:[#allocation7 + $0x98] ss:$24 sps:$4 sm:$0xff]   ;;  %v2705_v12 = vld [vmem:[#allocation7 + $0xc4] ss:$24 sps:$4 sm:$0xff]  }
 0x13d   :  { %2860 = vrcp.f32 %v396_v13  ;;  %v2708_v13 = vld [vmem:[#allocation7 + $0xcc] ss:$24 sps:$4 sm:$0xff]  }
 0x13e   :  { %2862 = vrcp.f32 %v397_v14  ;;  %v2703_v14 = vld [vmem:[#allocation7 + $0xc0] ss:$24 sps:$4 sm:$0xff]  }
 0x144   :  { %v2857_v15 = vpop.eup %2856 }
 0x145   :  { %v2859_v16 = vpop.eup %2858 }
 0x147   :  { %v2861_v17 = vpop.eup %2860 }
 0x148   :  { %v2863_v18 = vpop.eup %2862  ;;  %v406_v19 = vmul.f32 %v2861_v17, %v2857_v15  ;;  %v2706_v15 = vld [vmem:[#allocation7 + $0xc8] ss:$24 sps:$4 sm:$0xff]   ;;  %v2714_v17 = vld [vmem:[#allocation7 + $0xfc] ss:$24 sps:$4 sm:$0xff]  }
 0x149   :  { %v407_v20 = vmul.f32 %v2863_v18, %v2859_v16  ;;  %v2711_v16 = vld [vmem:[#allocation7 + $0xf4] ss:$24 sps:$4 sm:$0xff]   ;;  %v2709_v18 = vld [vmem:[#allocation7 + $0xf0] ss:$24 sps:$4 sm:$0xff]  }
 0x14a   :  { %v3136_v23 = vpack.c.bf16 %v406_v19, %v406_v19  ;;  %v2712_v19 = vld [vmem:[#allocation7 + $0xf8] ss:$24 sps:$4 sm:$0xff]  }
 0x14b   :  { %v505_v21 = vpack.c.bf16 %v407_v20, %v407_v20  ;;  %v2717_v20 = vld [vmem:[#allocation7 + $0x124] ss:$24 sps:$4 sm:$0xff]  }
 0x14d   :  { %1049 = vmatprep.mubr.bf16.mxu1 %v505_v21  ;;  %1090 = vmatprep.mubr.bf16.mxu0 %v505_v21 }
 0x14e   :  { %1050 = vmatmul.mubr.bf16.vlgmr.msra.gmra.mrb[4].mxu1 %v3136_v23  ;;  %1091 = vmatmul.mubr.bf16.vlgmr.msra.gmra.mrb[8].mxu0 %v3136_v23 }
 0x14f   :  { %1100 = vmatpush1.bf16.msra.mxu1 %v2631_v22  ;;  %1131 = vmatprep.mubr.bf16.mxu1 %v505_v21  ;;  %v2720_v21 = vld [vmem:[#allocation7 + $0x12c] ss:$24 sps:$4 sm:$0xff]   ;;  %v2715_v22 = vld [vmem:[#allocation7 + $0x120] ss:$24 sps:$4 sm:$0xff]  }
 0x150   :  { %1101 = vmatprep.subr.bf16.mxu1 %v2636_v24  ;;  %1782 = vmatpush1.bf16.msra.mxu0 %v2679_v60  ;;  %v2723_v24 = vld [vmem:[#allocation7 + $0x154] ss:$24 sps:$4 sm:$0xff]   ;;  %v2763_v60 = vld [vmem:[#allocation7 + $0x2a0] ss:$24 sps:$4 sm:$0xff]  }
 0x151   :  { %1783 = vmatprep.subr.bf16.mxu0 %v2687_v0  ;;  %v2769_v0 = vld [vmem:[#allocation7 + $0x2d0] ss:$24 sps:$4 sm:$0xff]  }
 0x153   :  { %1102 = vmatpush1.bf16.msra.mxu1 %v2634_v25  ;;  %v2726_v25 = vld [vmem:[#allocation7 + $0x15c] ss:$24 sps:$4 sm:$0xff]  }
 0x154   :  { %1103 = vmatprep.subr.bf16.mxu1 %v2639_v26  ;;  %1784 = vmatpush1.bf16.msra.mxu0 %v2685_v2  ;;  %v2721_v26 = vld [vmem:[#allocation7 + $0x150] ss:$24 sps:$4 sm:$0xff]   ;;  %v2777_v2 = vld [vmem:[#allocation7 + $0x14] ss:$24 sps:$4 sm:$0xff]  }
 0x155   :  { %1785 = vmatprep.subr.bf16.mxu0 %v2693_v4 }
 0x157   :  { %1104 = vmatpush1.bf16.msra.mxu1 %v2637_v27  ;;  %v2724_v27 = vld [vmem:[#allocation7 + $0x158] ss:$24 sps:$4 sm:$0xff]  }
 0x158   :  { %1105 = vmatprep.subr.bf16.mxu1 %v2642_v28  ;;  %1786 = vmatpush1.bf16.msra.mxu0 %v2691_v6  ;;  %v2729_v28 = vld [vmem:[#allocation7 + $0x184] ss:$24 sps:$4 sm:$0xff]  }
 0x159   :  { %1787 = vmatprep.subr.bf16.mxu0 %v2699_v8 }
 0x15b   :  { %1106 = vmatpush1.bf16.msra.mxu1 %v2640_v29  ;;  %v2727_v29 = vld [vmem:[#allocation7 + $0x180] ss:$24 sps:$4 sm:$0xff]  }
 0x15c   :  { %1107 = vmatprep.subr.bf16.mxu1 %v2645_v31  ;;  %1788 = vmatpush1.bf16.msra.mxu0 %v2697_v10  ;;  %v2732_v31 = vld [vmem:[#allocation7 + $0x18c] ss:$24 sps:$4 sm:$0xff]  }
 0x15d   :  { %1789 = vmatprep.subr.bf16.mxu0 %v2705_v12 }
 0x15f   :  { %1108 = vmatpush1.bf16.msra.mxu1 %v2643_v33  ;;  %v2730_v33 = vld [vmem:[#allocation7 + $0x188] ss:$24 sps:$4 sm:$0xff]  }
 0x160   :  { %1109 = vmatprep.subr.bf16.mxu1 %v2648_v34  ;;  %1790 = vmatpush1.bf16.msra.mxu0 %v2703_v14  ;;  %v2735_v34 = vld [vmem:[#allocation7 + $0x1b4] ss:$24 sps:$4 sm:$0xff]  }
 0x161   :  { %1791 = vmatprep.subr.bf16.mxu0 %v2711_v16 }
 0x163   :  { %1110 = vmatpush1.bf16.msra.mxu1 %v2646_v35  ;;  %v2733_v35 = vld [vmem:[#allocation7 + $0x1b0] ss:$24 sps:$4 sm:$0xff]  }
 0x164   :  { %1111 = vmatprep.subr.bf16.mxu1 %v2651_v36  ;;  %1792 = vmatpush1.bf16.msra.mxu0 %v2709_v18  ;;  %v2738_v36 = vld [vmem:[#allocation7 + $0x1bc] ss:$24 sps:$4 sm:$0xff]  }
 0x165   :  { %1793 = vmatprep.subr.bf16.mxu0 %v2717_v20 }
 0x167   :  { %1112 = vmatpush1.bf16.msra.mxu1 %v2649_v37  ;;  %v2736_v37 = vld [vmem:[#allocation7 + $0x1b8] ss:$24 sps:$4 sm:$0xff]  }
 0x168   :  { %1113 = vmatprep.subr.bf16.mxu1 %v2654_v38  ;;  %1794 = vmatpush1.bf16.msra.mxu0 %v2715_v22  ;;  %v2741_v38 = vld [vmem:[#allocation7 + $0x1e4] ss:$24 sps:$4 sm:$0xff]  }
 0x169   :  { %1795 = vmatprep.subr.bf16.mxu0 %v2723_v24 }
 0x16b   :  { %1114 = vmatpush1.bf16.msra.mxu1 %v2652_v39  ;;  %v2739_v39 = vld [vmem:[#allocation7 + $0x1e0] ss:$24 sps:$4 sm:$0xff]  }
 0x16c   :  { %1115 = vmatprep.subr.bf16.mxu1 %v2657_v40  ;;  %1796 = vmatpush1.bf16.msra.mxu0 %v2721_v26  ;;  %v2744_v40 = vld [vmem:[#allocation7 + $0x1ec] ss:$24 sps:$4 sm:$0xff]  }
 0x16d   :  { %1797 = vmatprep.subr.bf16.mxu0 %v2729_v28 }
 0x16f   :  { %1116 = vmatpush1.bf16.msra.mxu1 %v2655_v41  ;;  %v2742_v41 = vld [vmem:[#allocation7 + $0x1e8] ss:$24 sps:$4 sm:$0xff]  }
 0x170   :  { %1117 = vmatprep.subr.bf16.mxu1 %v2660_v42  ;;  %1798 = vmatpush1.bf16.msra.mxu0 %v2727_v29  ;;  %v2747_v42 = vld [vmem:[#allocation7 + $0x214] ss:$24 sps:$4 sm:$0xff]  }
 0x171   :  { %1799 = vmatprep.subr.bf16.mxu0 %v2735_v34 }
 0x173   :  { %1118 = vmatpush1.bf16.msra.mxu1 %v2658_v45  ;;  %v2745_v45 = vld [vmem:[#allocation7 + $0x210] ss:$24 sps:$4 sm:$0xff]  }
 0x174   :  { %1119 = vmatprep.subr.bf16.mxu1 %v2663_v46  ;;  %1800 = vmatpush1.bf16.msra.mxu0 %v2733_v35  ;;  %v2750_v46 = vld [vmem:[#allocation7 + $0x21c] ss:$24 sps:$4 sm:$0xff]  }
 0x175   :  { %1801 = vmatprep.subr.bf16.mxu0 %v2741_v38 }
 0x177   :  { %1120 = vmatpush1.bf16.msra.mxu1 %v2661_v47  ;;  %v2748_v47 = vld [vmem:[#allocation7 + $0x218] ss:$24 sps:$4 sm:$0xff]  }
 0x178   :  { %1121 = vmatprep.subr.bf16.mxu1 %v2666_v48  ;;  %1802 = vmatpush1.bf16.msra.mxu0 %v2739_v39  ;;  %v2753_v48 = vld [vmem:[#allocation7 + $0x244] ss:$24 sps:$4 sm:$0xff]  }
 0x179   :  { %1803 = vmatprep.subr.bf16.mxu0 %v2747_v42 }
 0x17b   :  { %1122 = vmatpush1.bf16.msra.mxu1 %v2664_v49  ;;  %v2751_v49 = vld [vmem:[#allocation7 + $0x240] ss:$24 sps:$4 sm:$0xff]  }
 0x17c   :  { %1123 = vmatprep.subr.bf16.mxu1 %v2669_v51  ;;  %1804 = vmatpush1.bf16.msra.mxu0 %v2745_v45  ;;  %v2756_v51 = vld [vmem:[#allocation7 + $0x24c] ss:$24 sps:$4 sm:$0xff]  }
 0x17d   :  { %1805 = vmatprep.subr.bf16.mxu0 %v2753_v48 }
 0x17f   :  { %1124 = vmatpush1.bf16.msra.mxu1 %v2667_v53  ;;  %v2754_v53 = vld [vmem:[#allocation7 + $0x248] ss:$24 sps:$4 sm:$0xff]  }
 0x180   :  { %1125 = vmatprep.subr.bf16.mxu1 %v2672_v54  ;;  %1806 = vmatpush1.bf16.msra.mxu0 %v2751_v49  ;;  %v2757_v54 = vld [vmem:[#allocation7 + $0x270] ss:$24 sps:$4 sm:$0xff]  }
 0x183   :  { %1126 = vmatpush1.bf16.msra.mxu1 %v2670_v55  ;;  %v2759_v55 = vld [vmem:[#allocation7 + $0x274] ss:$24 sps:$4 sm:$0xff]  }
 0x184   :  { %1127 = vmatprep.subr.bf16.mxu1 %v2675_v56  ;;  %v2760_v56 = vld [vmem:[#allocation7 + $0x278] ss:$24 sps:$4 sm:$0xff]   ;;  %1807 = vmatprep.subr.bf16.mxu0 %v2759_v55 }
 0x185   :  { %1808 = vmatpush1.bf16.msra.mxu0 %v2757_v54 }
 0x187   :  { %1128 = vmatpush1.bf16.msra.mxu1 %v2673_v57  ;;  %v2762_v57 = vld [vmem:[#allocation7 + $0x27c] ss:$24 sps:$4 sm:$0xff]  }
 0x188   :  { %1129 = vmatprep.subr.bf16.mxu1 %v2678_v58  ;;  %v2765_v58 = vld [vmem:[#allocation7 + $0x2a4] ss:$24 sps:$4 sm:$0xff]  }
 0x189   :  { %1809 = vmatprep.subr.bf16.mxu0 %v2765_v58 }
 0x18a   :  { %1810 = vmatpush1.bf16.msra.mxu0 %v2763_v60 }
 0x18b   :  { %1130 = vmatpush1.bf16.msra.mxu1 %v2676_v59  ;;  %v2768_v59 = vld [vmem:[#allocation7 + $0x2ac] ss:$24 sps:$4 sm:$0xff]  }
 0x18c   :  { %1822 = vmatprep.subr.bf16.mxu1 %v2684_v63  ;;  %v2774_v63 = vld [vmem:[#allocation7 + $0x2dc] ss:$24 sps:$4 sm:$0xff]  }
 0x18e   :  { %1132 = vmatmul.mubr.bf16.vlgmr.msra.gmra.mrb[8].mxu1 %v3136_v23  ;;  %v2718_v23 = vld [vmem:[#allocation7 + $0x128] ss:$24 sps:$4 sm:$0xff]  }
 0x18f   :  { %1823 = vmatpush1.bf16.msra.mxu1 %v2682_v62  ;;  %v2771_v62 = vld [vmem:[#allocation7 + $0x2d4] ss:$24 sps:$4 sm:$0xff]  }
 0x190   :  { %1824 = vmatprep.subr.bf16.mxu1 %v2690_v1  ;;  %1811 = vmatprep.subr.bf16.mxu0 %v2771_v62  ;;  %v2772_v1 = vld [vmem:[#allocation7 + $0x2d8] ss:$24 sps:$4 sm:$0xff]  }
 0x191   :  { %1812 = vmatpush1.bf16.msra.mxu0 %v2769_v0  ;;  %v2778_v62 = vld [vmem:[#allocation7 + $0x40] ss:$24 sps:$4 sm:$0xff]   ;;  %v2781_v0 = vld [vmem:[#allocation7 + $0x70] ss:$24 sps:$4 sm:$0xff]  }
 0x192   :  { %1863 = vmatprep.subr.bf16.mxu0 %v2777_v2  ;;  %v2784_v2 = vld [vmem:[#allocation7 + $0xa0] ss:$24 sps:$4 sm:$0xff]  }
 0x193   :  { %1825 = vmatpush1.bf16.msra.mxu1 %v2688_v3  ;;  %v70_v3 = vld [vmem:[%s3239_s6 + $0x6] sm:$0x3f] }
 0x194   :  { %1826 = vmatprep.subr.bf16.mxu1 %v2696_v5  ;;  %v510_v4 = vrot.slane %v70_v3, %v3115_v30  ;;  %v514_v5 = vrot.slane %v70_v3, %v3120_v32  ;;  %v518_v18 = vrot.slane %v70_v3, %v3124_v43  ;;  %v526_v34 = vrot.slane %v70_v3, %v3130_v50 }
 0x195   :  { %v530_v35 = vrot.slane %v70_v3, %v3132_v52 }
 0x197   :  { %1827 = vmatpush1.bf16.msra.mxu1 %v2694_v7 }
 0x198   :  { %1828 = vmatprep.subr.bf16.mxu1 %v2702_v9 }
 0x19b   :  { %1829 = vmatpush1.bf16.msra.mxu1 %v2700_v11 }
 0x19c   :  { %1830 = vmatprep.subr.bf16.mxu1 %v2708_v13 }
 0x19f   :  { %1831 = vmatpush1.bf16.msra.mxu1 %v2706_v15 }
 0x1a0   :  { %1832 = vmatprep.subr.bf16.mxu1 %v2714_v17 }
 0x1a3   :  { %1833 = vmatpush1.bf16.msra.mxu1 %v2712_v19  ;;  %v522_v19 = vrot.slane %v70_v3, %v3126_v44  ;;  %v2789_v3 = vld [vmem:[#allocation7 + $0xd4] ss:$24 sps:$4 sm:$0xff]  }
 0x1a4   :  { %1834 = vmatprep.subr.bf16.mxu1 %v2720_v21 }
 0x1a7   :  { %1835 = vmatpush1.bf16.msra.mxu1 %v2718_v23 }
 0x1a8   :  { %1836 = vmatprep.subr.bf16.mxu1 %v2726_v25 }
 0x1ab   :  { %1837 = vmatpush1.bf16.msra.mxu1 %v2724_v27 }
 0x1ac   :  { %1838 = vmatprep.subr.bf16.mxu1 %v2732_v31 }
 0x1af   :  { %1839 = vmatpush1.bf16.msra.mxu1 %v2730_v33 }
 0x1b0   :  { %1840 = vmatprep.subr.bf16.mxu1 %v2738_v36 }
 0x1b3   :  { %1841 = vmatpush1.bf16.msra.mxu1 %v2736_v37 }
 0x1b4   :  { %1842 = vmatprep.subr.bf16.mxu1 %v2744_v40 }
 0x1b7   :  { %1843 = vmatpush1.bf16.msra.mxu1 %v2742_v41 }
 0x1b8   :  { %1844 = vmatprep.subr.bf16.mxu1 %v2750_v46 }
 0x1bb   :  { %1845 = vmatpush1.bf16.msra.mxu1 %v2748_v47 }
 0x1bc   :  { %1846 = vmatprep.subr.bf16.mxu1 %v2756_v51 }
 0x1bf   :  { %1847 = vmatpush1.bf16.msra.mxu1 %v2754_v53 }
 0x1c0   :  { %1848 = vmatprep.subr.bf16.mxu1 %v2762_v57 }
 0x1c3   :  { %1849 = vmatpush1.bf16.msra.mxu1 %v2760_v56 }
 0x1c4   :  { %1850 = vmatprep.subr.bf16.mxu1 %v2768_v59  ;;  %v2775_v59 = vld [vmem:[#allocation7 + $0x10] ss:$24 sps:$4 sm:$0xff]  }
 0x1c7   :  { %1851 = vmatpush1.bf16.msra.mxu1 %v2766_v61  ;;  %v2780_v61 = vld [vmem:[#allocation7 + $0x44] ss:$24 sps:$4 sm:$0xff]  }
 0x1c8   :  { %1852 = vmatprep.subr.bf16.mxu1 %v2774_v63  ;;  %v2783_v63 = vld [vmem:[#allocation7 + $0x74] ss:$24 sps:$4 sm:$0xff]  }
 0x1cb   :  { %1853 = vmatpush1.bf16.msra.mxu1 %v2772_v1  ;;  %v2786_v1 = vld [vmem:[#allocation7 + $0xa4] ss:$24 sps:$4 sm:$0xff]  }
 0x221   :  { %v1051_v6 = vpop.f32.mrb[4].mxu1  ;;  %v1092_v7 = vpop.f32.mrb[8].mxu0 }
 0x222   :  { %v1052_v8 = vadd.f32 %v1051_v6, %v510_v4  ;;  %v1053_v9 = vpop.f32.mrb[5].mxu1  ;;  %v1094_v10 = vpop.f32.mrb[9].mxu0  ;;  %v1093_v20 = vadd.f32 %v1092_v7, %v518_v18  ;;  %v2787_v4 = vld [vmem:[#allocation7 + $0xd0] ss:$24 sps:$4 sm:$0xff]   ;;  %v2790_v6 = vld [vmem:[#allocation7 + $0x100] ss:$24 sps:$4 sm:$0xff]  }
 0x223   :  { %v1054_v11 = vadd.f32 %v1053_v9, %v514_v5  ;;  %v1055_v12 = vpop.f32.mrb[6].mxu1  ;;  %v1096_v13 = vpop.f32.mrb[10].mxu0  ;;  %v1095_v21 = vadd.f32 %v1094_v10, %v522_v19  ;;  %v2792_v5 = vld [vmem:[#allocation7 + $0x104] ss:$24 sps:$4 sm:$0xff]   ;;  %v2795_v7 = vld [vmem:[#allocation7 + $0x134] ss:$24 sps:$4 sm:$0xff]  }
 0x224   :  { %v2336_v14 = vmul.f32 -1.442695, %v1052_v8  ;;  %v1056_v15 = vpop.f32.mrb[7].mxu1  ;;  %v1097_v16 = vpop.f32.mrb[11].mxu0  ;;  %v2793_v8 = vld [vmem:[#allocation7 + $0x130] ss:$24 sps:$4 sm:$0xff]  }
 0x225   :  { %v2337_v17 = vmul.f32 -1.442695, %v1054_v11  ;;  %v2798_v9 = vld [vmem:[#allocation7 + $0x164] ss:$24 sps:$4 sm:$0xff]   ;;  %v2796_v10 = vld [vmem:[#allocation7 + $0x160] ss:$24 sps:$4 sm:$0xff]  }
 0x226   :  { %2864 = vpow2.f32 %v2336_v14  ;;  %v2801_v11 = vld [vmem:[#allocation7 + $0x194] ss:$24 sps:$4 sm:$0xff]   ;;  %v2799_v12 = vld [vmem:[#allocation7 + $0x190] ss:$24 sps:$4 sm:$0xff]   ;;  %v2804_v13 = vld [vmem:[#allocation7 + $0x1c4] ss:$24 sps:$4 sm:$0xff]  }
 0x227   :  { %2866 = vpow2.f32 %v2337_v17  ;;  %v2802_v14 = vld [vmem:[#allocation7 + $0x1c0] ss:$24 sps:$4 sm:$0xff]   ;;  %v2807_v15 = vld [vmem:[#allocation7 + $0x1f4] ss:$24 sps:$4 sm:$0xff]   ;;  %v2805_v16 = vld [vmem:[#allocation7 + $0x1f0] ss:$24 sps:$4 sm:$0xff]  }
 0x228   :  { %2868 = vtanh.f32 %v1093_v20  ;;  %v2810_v17 = vld [vmem:[#allocation7 + $0x224] ss:$24 sps:$4 sm:$0xff]   ;;  %v2808_v18 = vld [vmem:[#allocation7 + $0x220] ss:$24 sps:$4 sm:$0xff]   ;;  %v2813_v19 = vld [vmem:[#allocation7 + $0x254] ss:$24 sps:$4 sm:$0xff]  }
 0x229   :  { %2870 = vtanh.f32 %v1095_v21  ;;  %v2811_v20 = vld [vmem:[#allocation7 + $0x250] ss:$24 sps:$4 sm:$0xff]   ;;  %v2816_v21 = vld [vmem:[#allocation7 + $0x284] ss:$24 sps:$4 sm:$0xff]  }
 0x230   :  { %v2865_v22 = vpop.eup %2864 }
 0x231   :  { %v2867_v23 = vpop.eup %2866  ;;  %v1146_v24 = vadd.f32 1.0, %v2865_v22  ;;  %v2814_v22 = vld [vmem:[#allocation7 + $0x280] ss:$24 sps:$4 sm:$0xff]  }
 0x232   :  { %v1147_v25 = vadd.f32 1.0, %v2867_v23  ;;  %v2869_v26 = vpop.eup %2868  ;;  %v2819_v23 = vld [vmem:[#allocation7 + $0x2b4] ss:$24 sps:$4 sm:$0xff]  }
 0x233   :  { %2872 = vrcp.f32 %v1146_v24  ;;  %v2871_v27 = vpop.eup %2870  ;;  %v2817_v24 = vld [vmem:[#allocation7 + $0x2b0] ss:$24 sps:$4 sm:$0xff]  }
 0x234   :  { %2874 = vrcp.f32 %v1147_v25  ;;  %v2822_v25 = vld [vmem:[#allocation7 + $0x2e4] ss:$24 sps:$4 sm:$0xff]  }
 0x23d   :  { %v2873_v28 = vpop.eup %2872 }
 0x23e   :  { %v2875_v29 = vpop.eup %2874  ;;  %v1166_v31 = vmul.f32 %v2873_v28, %v2869_v26  ;;  %v2820_v26 = vld [vmem:[#allocation7 + $0x2e0] ss:$24 sps:$4 sm:$0xff]  }
 0x23f   :  { %v1167_v33 = vmul.f32 %v2875_v29, %v2871_v27  ;;  %v71_v27 = vld [vmem:[%s3239_s6 + $0xc] sm:$0x3f] }
 0x240   :  { %v1274_v28 = vrot.slane %v71_v27, %v3115_v30  ;;  %v1278_v29 = vrot.slane %v71_v27, %v3120_v32  ;;  %v1286_v30 = vrot.slane %v71_v27, %v3126_v44  ;;  %v1294_v44 = vrot.slane %v71_v27, %v3132_v52 }
 0x261   :  { %v1133_v36 = vpop.f32.mrb[8].mxu1 }
 0x262   :  { %v1134_v37 = vadd.f32 %v1133_v36, %v526_v34  ;;  %v1135_v38 = vpop.f32.mrb[9].mxu1 }
 0x263   :  { %v1136_v39 = vadd.f32 %v1135_v38, %v530_v35  ;;  %v1137_v40 = vpop.f32.mrb[10].mxu1 }
 0x264   :  { %v2338_v41 = vmul.f32 -1.442695, %v1134_v37  ;;  %v1138_v42 = vpop.f32.mrb[11].mxu1 }
 0x265   :  { %v2339_v45 = vmul.f32 -1.442695, %v1136_v39 }
 0x266   :  { %2876 = vpow2.f32 %v2338_v41 }
 0x267   :  { %2878 = vpow2.f32 %v2339_v45 }
 0x268   :  { %2880 = vtanh.f32 %v1166_v31 }
 0x269   :  { %2882 = vtanh.f32 %v1167_v33 }
 0x270   :  { %v2877_v46 = vpop.eup %2876 }
 0x271   :  { %v2879_v47 = vpop.eup %2878  ;;  %v1160_v48 = vadd.f32 1.0, %v2877_v46  ;;  %v1282_v46 = vrot.slane %v71_v27, %v3124_v43  ;;  %v1290_v43 = vrot.slane %v71_v27, %v3130_v50  ;;  %v2830_v27 = vld [vmem:[%s3237_s4 + $0x18] sm:$0xff]  }
 0x272   :  { %v1161_v49 = vadd.f32 1.0, %v2879_v47  ;;  %v2881_v51 = vpop.eup %2880 }
 0x273   :  { %2884 = vrcp.f32 %v1160_v48  ;;  %v2883_v53 = vpop.eup %2882 }
 0x274   :  { %2886 = vrcp.f32 %v1161_v49 }
 0x27d   :  { %v2885_v54 = vpop.eup %2884 }
 0x27e   :  { %v2887_v55 = vpop.eup %2886  ;;  %v1170_v56 = vmul.f32 %v2885_v54, %v2881_v51 }
 0x27f   :  { %v1171_v57 = vmul.f32 %v2887_v55, %v2883_v53 }
 0x280   :  { %v3150_v60 = vpack.c.bf16 %v1170_v56, %v1170_v56 }
 0x281   :  { %v1269_v58 = vpack.c.bf16 %v1171_v57, %v1171_v57 }
 0x283   :  { %1813 = vmatprep.mubr.bf16.mxu0 %v1269_v58  ;;  %1854 = vmatprep.mubr.bf16.mxu1 %v1269_v58 }
 0x284   :  { %1814 = vmatmul.mubr.bf16.vlgmr.msra.gmra.mrb[12].mxu0 %v3150_v60  ;;  %1855 = vmatmul.mubr.bf16.vlgmr.msra.gmra.mrb[12].mxu1 %v3150_v60 }
 0x285   :  { %1864 = vmatpush1.bf16.msra.mxu0 %v2775_v59  ;;  %1895 = vmatprep.mubr.bf16.mxu0 %v1269_v58 }
 0x286   :  { %1865 = vmatprep.subr.bf16.mxu0 %v2780_v61 }
 0x289   :  { %1866 = vmatpush1.bf16.msra.mxu0 %v2778_v62 }
 0x28a   :  { %1867 = vmatprep.subr.bf16.mxu0 %v2783_v63 }
 0x28d   :  { %1868 = vmatpush1.bf16.msra.mxu0 %v2781_v0 }
 0x28e   :  { %1869 = vmatprep.subr.bf16.mxu0 %v2786_v1 }
 0x291   :  { %1870 = vmatpush1.bf16.msra.mxu0 %v2784_v2 }
 0x292   :  { %1871 = vmatprep.subr.bf16.mxu0 %v2789_v3 }
 0x295   :  { %1872 = vmatpush1.bf16.msra.mxu0 %v2787_v4 }
 0x296   :  { %1873 = vmatprep.subr.bf16.mxu0 %v2792_v5 }
 0x299   :  { %1874 = vmatpush1.bf16.msra.mxu0 %v2790_v6 }
 0x29a   :  { %1875 = vmatprep.subr.bf16.mxu0 %v2795_v7 }
 0x29d   :  { %1876 = vmatpush1.bf16.msra.mxu0 %v2793_v8 }
 0x29e   :  { %1877 = vmatprep.subr.bf16.mxu0 %v2798_v9 }
 0x2a1   :  { %1878 = vmatpush1.bf16.msra.mxu0 %v2796_v10 }
 0x2a2   :  { %1879 = vmatprep.subr.bf16.mxu0 %v2801_v11 }
 0x2a5   :  { %1880 = vmatpush1.bf16.msra.mxu0 %v2799_v12 }
 0x2a6   :  { %1881 = vmatprep.subr.bf16.mxu0 %v2804_v13  ;;  %v2823_v13 = vld [vmem:[%s3237_s4 + $0x40] sm:$0xff]  }
 0x2a7   :  { %2460 = vmatprep.subr.bf16.mxu1 %v2823_v13 }
 0x2a9   :  { %1882 = vmatpush1.bf16.msra.mxu0 %v2802_v14  ;;  %v2824_v14 = vld [vmem:[%s3237_s4] sm:$0xff]  }
 0x2aa   :  { %1883 = vmatprep.subr.bf16.mxu0 %v2807_v15  ;;  %v2825_v15 = vld [vmem:[%s3237_s4 + $0x48] sm:$0xff]   ;;  %2461 = vmatpush3.bf16.msra.mxu1 %v2824_v14 }
 0x2ab   :  { %2462 = vmatprep.subr.bf16.mxu1 %v2825_v15 }
 0x2ad   :  { %1884 = vmatpush1.bf16.msra.mxu0 %v2805_v16  ;;  %v2826_v16 = vld [vmem:[%s3237_s4 + $0x8] sm:$0xff]  }
 0x2ae   :  { %1885 = vmatprep.subr.bf16.mxu0 %v2810_v17  ;;  %v2827_v17 = vld [vmem:[%s3237_s4 + $0x50] sm:$0xff]   ;;  %2463 = vmatpush3.bf16.msra.mxu1 %v2826_v16 }
 0x2af   :  { %2464 = vmatprep.subr.bf16.mxu1 %v2827_v17 }
 0x2b1   :  { %1886 = vmatpush1.bf16.msra.mxu0 %v2808_v18  ;;  %v2828_v18 = vld [vmem:[%s3237_s4 + $0x10] sm:$0xff]  }
 0x2b2   :  { %1887 = vmatprep.subr.bf16.mxu0 %v2813_v19  ;;  %2465 = vmatpush3.bf16.msra.mxu1 %v2828_v18 }
 0x2b5   :  { %1888 = vmatpush1.bf16.msra.mxu0 %v2811_v20 }
 0x2b6   :  { %1889 = vmatprep.subr.bf16.mxu0 %v2816_v21 }
 0x2b9   :  { %1890 = vmatpush1.bf16.msra.mxu0 %v2814_v22 }
 0x2ba   :  { %1891 = vmatprep.subr.bf16.mxu0 %v2819_v23 }
 0x2bd   :  { %1892 = vmatpush1.bf16.msra.mxu0 %v2817_v24 }
 0x2be   :  { %1893 = vmatprep.subr.bf16.mxu0 %v2822_v25 }
 0x2c1   :  { %1894 = vmatpush1.bf16.msra.mxu0 %v2820_v26  ;;  %v2829_v26 = vld [vmem:[%s3237_s4 + $0x58] sm:$0xff]  }
 0x2c2   :  { %2466 = vmatprep.subr.bf16.mxu1 %v2829_v26 }
 0x2c3   :  { %2467 = vmatpush3.bf16.msra.mxu1 %v2830_v27 }
 0x2c4   :  { %1896 = vmatmul.mubr.bf16.vlgmr.msra.gmra.mrb[16].mxu0 %v3150_v60 }
 0x357   :  { %v1815_v31 = vpop.f32.mrb[12].mxu0  ;;  %v1856_v33 = vpop.f32.mrb[12].mxu1 }
 0x358   :  { %v1816_v34 = vadd.f32 %v1815_v31, %v1274_v28  ;;  %v1817_v35 = vpop.f32.mrb[13].mxu0  ;;  %v1858_v36 = vpop.f32.mrb[13].mxu1  ;;  %v1857_v47 = vadd.f32 %v1856_v33, %v1282_v46  ;;  %v2831_v28 = vld [vmem:[%s3237_s4 + $0x60] sm:$0xff]   ;;  %v2833_v31 = vld [vmem:[%s3237_s4 + $0x68] sm:$0xff]  }
 0x359   :  { %v1818_v37 = vadd.f32 %v1817_v35, %v1278_v29  ;;  %v1819_v38 = vpop.f32.mrb[14].mxu0  ;;  %v1860_v39 = vpop.f32.mrb[14].mxu1  ;;  %v1859_v32 = vadd.f32 %v1858_v36, %v1286_v30  ;;  %v2832_v29 = vld [vmem:[%s3237_s4 + $0x20] sm:$0xff]   ;;  %2468 = vmatprep.subr.bf16.mxu1 %v2831_v28  ;;  %v2834_v33 = vld [vmem:[%s3237_s4 + $0x28] sm:$0xff]   ;;  %v2836_v35 = vld [vmem:[%s3237_s4 + $0x30] sm:$0xff]  }
 0x35a   :  { %v2436_v40 = vmul.f32 -1.442695, %v1816_v34  ;;  %v1820_v41 = vpop.f32.mrb[15].mxu0  ;;  %v1861_v42 = vpop.f32.mrb[15].mxu1  ;;  %2469 = vmatpush3.bf16.msra.mxu1 %v2832_v29  ;;  %v2835_v34 = vld [vmem:[%s3237_s4 + $0x70] sm:$0xff]   ;;  %v2837_v36 = vld [vmem:[%s3237_s4 + $0x78] sm:$0xff]  }
 0x35b   :  { %v2437_v45 = vmul.f32 -1.442695, %v1818_v37  ;;  %2470 = vmatprep.subr.bf16.mxu1 %v2833_v31  ;;  %v2838_v37 = vld [vmem:[%s3237_s4 + $0x38] sm:$0xff]  }
 0x35c   :  { %2888 = vpow2.f32 %v2436_v40 }
 0x35d   :  { %2890 = vpow2.f32 %v2437_v45 }
 0x35e   :  { %2892 = vtanh.f32 %v1857_v47  ;;  %2471 = vmatpush3.bf16.msra.mxu1 %v2834_v33  ;;  %v2839_v47 = vld [vmem:[%s3238_s5] sm:$0xff]  }
 0x35f   :  { %2894 = vtanh.f32 %v1859_v32  ;;  %2472 = vmatprep.subr.bf16.mxu1 %v2835_v34  ;;  %v3014_v32 = vmov 0.0  }
 0x360   :  { %2484 = vmatprep.subr.bf16.mxu0 %v3014_v32  ;;  %2486 = vmatprep.mubr.msk.bf16.mxu0 %vm3015_vm1, %v3014_v32 }
 0x361   :  { %2485 = vmatpush3.bf16.msra.mxu0 %v2839_v47 }
 0x362   :  { %2473 = vmatpush3.bf16.msra.mxu1 %v2836_v35 }
 0x363   :  { %2474 = vmatprep.subr.bf16.mxu1 %v2837_v36 }
 0x366   :  { %v2889_v48 = vpop.eup %2888  ;;  %2475 = vmatpush3.bf16.msra.mxu1 %v2838_v37 }
 0x367   :  { %v2891_v49 = vpop.eup %2890  ;;  %v1910_v51 = vadd.f32 1.0, %v2889_v48 }
 0x368   :  { %v1911_v53 = vadd.f32 1.0, %v2891_v49  ;;  %v2893_v54 = vpop.eup %2892  ;;  %v2440_v49 = vld [vmem:[%s3239_s6 + $0x12] ss:$0 sm:$0xff] }
 0x369   :  { %2896 = vrcp.f32 %v1910_v51  ;;  %v2895_v55 = vpop.eup %2894 }
 0x36a   :  { %2898 = vrcp.f32 %v1911_v53 }
 0x373   :  { %v2897_v56 = vpop.eup %2896 }
 0x374   :  { %v2899_v57 = vpop.eup %2898  ;;  %v1930_v58 = vmul.f32 %v2897_v56, %v2893_v54 }
 0x375   :  { %v1931_v59 = vmul.f32 %v2899_v57, %v2895_v55 }
 0x397   :  { %v1897_v60 = vpop.f32.mrb[16].mxu0 }
 0x398   :  { %v1898_v61 = vadd.f32 %v1897_v60, %v1290_v43  ;;  %v1899_v62 = vpop.f32.mrb[17].mxu0 }
 0x399   :  { %v1900_v63 = vadd.f32 %v1899_v62, %v1294_v44  ;;  %v1901_v0 = vpop.f32.mrb[18].mxu0 }
 0x39a   :  { %v2438_v1 = vmul.f32 -1.442695, %v1898_v61  ;;  %v1902_v2 = vpop.f32.mrb[19].mxu0 }
 0x39b   :  { %v2439_v3 = vmul.f32 -1.442695, %v1900_v63 }
 0x39c   :  { %2900 = vpow2.f32 %v2438_v1 }
 0x39d   :  { %2902 = vpow2.f32 %v2439_v3 }
 0x39e   :  { %2904 = vtanh.f32 %v1930_v58 }
 0x39f   :  { %2906 = vtanh.f32 %v1931_v59  ;;  %v2457_v59 = vld [vmem:[%s3239_s6 + $0x13] ss:$0 sm:$0xff] }
 0x3a6   :  { %v2901_v4 = vpop.eup %2900 }
 0x3a7   :  { %v2903_v5 = vpop.eup %2902  ;;  %v1924_v6 = vadd.f32 1.0, %v2901_v4 }
 0x3a8   :  { %v1925_v7 = vadd.f32 1.0, %v2903_v5  ;;  %v2905_v50 = vpop.eup %2904 }
 0x3a9   :  { %2908 = vrcp.f32 %v1924_v6  ;;  %v2907_v52 = vpop.eup %2906 }
 0x3aa   :  { %2910 = vrcp.f32 %v1925_v7 }
 0x3b3   :  { %v2909_v8 = vpop.eup %2908 }
 0x3b4   :  { %v2911_v9 = vpop.eup %2910  ;;  %v1934_v10 = vmul.f32 %v2909_v8, %v2905_v50 }
 0x3b5   :  { %v1935_v11 = vmul.f32 %v2911_v9, %v2907_v52 }
 0x3b7   :  { %v1936_v12 = vadd.f32 %v1935_v11, %v1934_v10 }
 0x3b9   :  { %1937 = vadd.xlane.f32.xlu0 %v1936_v12 }
 0x446   :  { %v1938_v19 = vpop.xlane.xlu0 %1937 }
 0x447   :  { %v1940_v20 = vmul.f32 0.00390625, %v1938_v19 }
 0x449   :  { %v1941_v21 = vsub.f32 %v1934_v10, %v1940_v20  ;;  %v1942_v22 = vsub.f32 %v1935_v11, %v1940_v20 }
 0x44b   :  { %v1943_v23 = vmul.f32 %v1941_v21, %v1941_v21  ;;  %v1944_v24 = vmul.f32 %v1942_v22, %v1942_v22 }
 0x44d   :  { %v1945_v25 = vadd.f32 %v1944_v24, %v1943_v23 }
 0x44f   :  { %1946 = vadd.xlane.f32.xlu0 %v1945_v25 }
 0x4dc   :  { %v1947_v38 = vpop.xlane.xlu0 %1946 }
 0x4dd   :  { %v1948_v39 = vmul.f32 0.00390625, %v1947_v38 }
 0x4df   :  { %v1949_v40 = vadd.f32 1e-05, %v1948_v39 }
 0x4e1   :  { %2912 = vrsqrt.f32 %v1949_v40 }
 0x4eb   :  { %v2913_v41 = vpop.eup %2912 }
 0x4ec   :  { %v1952_v42 = vmul.f32 %v2913_v41, %v1942_v22  ;;  %v1951_v45 = vmul.f32 %v2913_v41, %v1941_v21 }
 0x4ee   :  { %v1956_v46 = vpack.c.bf16 %v1952_v42, %v1952_v42  ;;  %v1955_v30 = vpack.c.bf16 %v1951_v45, %v1951_v45 }
 0x4f0   :  { %2123 = vmatprep.mubr.bf16.mxu1 %v1956_v46 }
 0x4f1   :  { %2124 = vmatmul.mubr.bf16.vlgmr.msra.gmra.mrb[16].mxu1 %v1955_v30 }
 0x5c4   :  { %v2476_v48 = vpop.f32.mrb[16].mxu1 }
 0x5c5   :  { %v2477_v51 = vpop.f32.mrb[17].mxu1 }
 0x5c6   :  { %v2478_v53 = vadd.f32 %v2477_v51, %v2476_v48  ;;  %v2479_v54 = vpop.f32.mrb[18].mxu1 }
 0x5c7   :  { %v2480_v55 = vpop.f32.mrb[19].mxu1 }
 0x5c8   :  { %v2126_v56 = vadd.f32 %v2478_v53, %v2440_v49 }
 0x5ca   :  { %v2131_v57 = vmax.f32 %v2126_v56, 0.0 }
 0x5cc   :  { %v2132_v58 = vpack.c.bf16 %v2131_v57, %v2131_v57 }
 0x5ce   :  { %2487 = vmatmul.mubr.msk.bf16.vlgmr.msra.gmra.mrb[20].mxu0 %vm2147_vm2, %v2132_v58 }
 0x6a1   :  { %v2185_v43 = vpop.f32.mrb[20].mxu0 }
 0x6a2   :  { %v2186_v44 = vadd.f32 %v2457_v59, %v2185_v43  ;;  %v2488_v60 = vpop.f32.mrb[21].mxu0 }
 0x6a3   :  { %v2188_v61 = vpop.f32.mrb[22].mxu0 }
 0x6a4   :  { %v2489_v62 = vpop.f32.mrb[23].mxu0  ;;  %2192 = vst.msk [vmem:[#allocation8] sm:$0xff] %vm2191_vm3, %v2186_v44 }
 0x6a5   :  { %2991 = shalt.err (!%p2988_p0)
}
 0x6a6   :  { %s2992_s6 = scalar_lea.hbm %s3240_s7, 128 }
 0x6a7   :  { %p2993_p1 = scmp.ne.s32.totalorder %s3240_s7, %s2992_s6  ;;  %p2996_p2 = scmp.lt.u32.totalorder %s2992_s6, %s3240_s7 }
 0x6a9   :  { %p2998_p3 = pnand %p2996_p2, %p2993_p1 }
 0x6ab   :  { %3001 = shalt.err (!%p2998_p3)
}
 0x6ac   :  { %2202 = dma.vmem_to_hbm [thread:$0]  %s2200_s30, 128, %s3240_s7, [#allocation4]  }
 0x6ad   :  { %3006 = dma.done.wait [#allocation4], 128  }
 0x6ae   :  { %3007 = vsyncadd [#allocation4], 4294967168 }
 0x6af   :  { %2206 = vsyncpa [#allocation3], 1 }
 0x6b0   :  { %2207 = vsyncpa [#allocation6], 1 }
 0x6b1   :  { %2208 = vsyncpa [#allocation4], 1 }

</bundles_post_ra>
